<compile_context>
chip_gen: v6e
topology: v6e:2x2x1
jax: 0.10.0
libtpu: 0.0.40
codegen_flags: <defaults>
</compile_context>

<pallas_src>
import functools

import numpy as np
import jax
import jax.numpy as jnp
from jax.experimental import pallas as pl
from jax.experimental.pallas import tpu as pltpu


# --------------------------------------------------------------------------
# Lanczos lgamma machinery (lgamma has no Mosaic lowering).
# --------------------------------------------------------------------------
_LANCZOS_COEF = (
    0.99999999999980993,
    676.5203681218851,
    -1259.1392167224028,
    771.32342877765313,
    -176.61502916214059,
    12.507343278686905,
    -0.13857109526572012,
    9.9843695780195716e-6,
    1.5056327351493116e-7,
)
_LANCZOS_G = 7.0
_HALF_LOG_2PI = 0.5 * float(np.log(2.0 * np.pi))
# lgamma(k+r) - lgamma(r) - lgamma(k+1): the three `-t` linear terms sum to
# +(g+0.5) and the three half-log-2pi constants sum to -half_log_2pi.
_LGAMMA_DIFF_CONST = (_LANCZOS_G + 0.5) - _HALF_LOG_2PI
# Clamp used only inside the rational part so the degree-8 products stay
# within f32 range; induces < 1e-3 abs lgamma error, and only for z > 3e4.
# TODO(synk): for exact very-large-count lgamma (k >~ 3e4) add a Stirling branch.
_Z_CLAMP = 30000.0


def _softplus(x):
    return jnp.maximum(x, 0.0) + jnp.log(1.0 + jnp.exp(-jnp.abs(x)))


def _logaddexp(a, b):
    return jnp.maximum(a, b) + jnp.log(1.0 + jnp.exp(-jnp.abs(a - b)))


def _lanczos_pq(z):
    """Rational form of the Lanczos series: a(z) = c0 + sum_i c_i/(z+i) = P/Q.

    Built as a pairwise rational-combination tree (all VALU mul/add, positive
    denominators for z > -1), so no division happens here; the caller does a
    single divide per lgamma instead of eight.
    """
    c = _LANCZOS_COEF
    zc = jnp.minimum(z, _Z_CLAMP)
    f = [zc + float(j) for j in range(1, 9)]                     # z+1 ... z+8
    # level 1: combine terms (1,2), (3,4), (5,6), (7,8)
    n1 = [c[i + 1] * f[i + 1] + c[i + 2] * f[i] for i in (0, 2, 4, 6)]
    d1 = [f[i] * f[i + 1] for i in (0, 2, 4, 6)]
    # level 2
    n2 = [n1[0] * d1[1] + n1[1] * d1[0], n1[2] * d1[3] + n1[3] * d1[2]]
    d2 = [d1[0] * d1[1], d1[2] * d1[3]]
    # level 3
    num = n2[0] * d2[1] + n2[1] * d2[0]
    den = d2[0] * d2[1]
    # a(z) = c0 + num/den = (c0*den + num) / den
    return c[0] * den + num, den


def _lgamma_diff(k, r):
    """lgamma(k + r) - lgamma(r) - lgamma(k + 1) via a fused Lanczos expansion.

    Per term: lgamma(x) = 0.5*log(2pi) + (z+0.5)*log(z+g+0.5) - (z+g+0.5) + log(a(z)),
    with z = x - 1. Constants and linear terms fold into _LGAMMA_DIFF_CONST;
    the three log(a) terms fold into one log of a product of ratios.
    """
    z1 = k + r - 1.0
    z2 = r - 1.0
    z3 = k
    gh = _LANCZOS_G + 0.5
    p1, q1 = _lanczos_pq(z1)
    p2, q2 = _lanczos_pq(z2)
    p3, q3 = _lanczos_pq(z3)
    ratio = (p1 / q1) * (q2 / p2) * (q3 / p3)                    # a1 / (a2 * a3)
    return (_LGAMMA_DIFF_CONST
            + (z1 + 0.5) * jnp.log(z1 + gh)
            - (z2 + 0.5) * jnp.log(z2 + gh)
            - (z3 + 0.5) * jnp.log(z3 + gh)
            + jnp.log(ratio))


def _zinb_nll_elementwise(k, m_log, r_log, pi):
    r = jnp.exp(r_log)
    log_r_plus_m = _logaddexp(r_log, m_log)
    nb_log = (_lgamma_diff(k, r)
              + r * (r_log - log_r_plus_m)
              + k * (m_log - log_r_plus_m))
    # k == 0: log(pi + (1-pi)*NB(0));  k > 0: log((1-pi)*NB(k))
    ll = jnp.where(k < 0.5, _logaddexp(pi, nb_log), nb_log) - _softplus(pi)
    return -ll


# --------------------------------------------------------------------------
# Pallas kernels.
# --------------------------------------------------------------------------
def _zinb_elem_kernel(x_ref, mlog_ref, rlog_ref, pilogit_ref, nll_ref):
    nll = _zinb_nll_elementwise(
        x_ref[...].astype(jnp.float32),
        mlog_ref[...].astype(jnp.float32),
        rlog_ref[...].astype(jnp.float32),
        pilogit_ref[...].astype(jnp.float32),
    )
    nll_ref[...] = nll.astype(nll_ref.dtype)


def _zinb_sum_kernel(x_ref, mlog_ref, rlog_ref, pilogit_ref, part_ref, *,
                     block_rows, valid_rows):
    nll = _zinb_nll_elementwise(
        x_ref[...].astype(jnp.float32),
        mlog_ref[...].astype(jnp.float32),
        rlog_ref[...].astype(jnp.float32),
        pilogit_ref[...].astype(jnp.float32),
    )
    if valid_rows % block_rows != 0:  # static: only the padded case traces a mask
        i = pl.program_id(0)
        row_ids = jax.lax.broadcasted_iota(jnp.int32, (block_rows, 1), 0) + i * block_rows
        nll = jnp.where(row_ids < valid_rows, nll, 0.0)
    s = jnp.sum(nll, axis=0, keepdims=True)       # (1, G)  cross-sublane reduce
    s = jnp.sum(s, axis=1, keepdims=True)         # (1, 1)  cross-lane reduce
    # One independent (8,128) partial tile per grid block -> grid can be "parallel".
    part_ref[...] = jnp.zeros(part_ref.shape, jnp.float32) + s


# --------------------------------------------------------------------------
# Wrapper.
# --------------------------------------------------------------------------
def _pick_block_rows(batch, genes, target_tile_bytes=256 * 1024):
    bytes_per_row = genes * 4
    tb = max(8, target_tile_bytes // bytes_per_row)
    tb = max(8, (tb // 8) * 8)
    b_ceil = ((batch + 7) // 8) * 8
    tb = min(tb, b_ceil)
    return max(8, (tb // 8) * 8)


def zinb_loss_log_ver(x, mean_log, r_log, pi_logit, reduction='sum'):
    """Pallas implementation of ZeroInflatedNegativeBinomialLossLogVer.forward.

    x, mean_log, r_log, pi_logit: arrays with genes on the last axis (any
    float/int dtype; math is done in f32 inside the kernel). Returns a scalar
    for reduction in {'sum','mean'}, or the elementwise NLL for reduction=None.
    """
    orig_shape = x.shape
    G = orig_shape[-1]
    x2 = jnp.reshape(x, (-1, G))
    m2 = jnp.reshape(mean_log, (-1, G))
    r2 = jnp.reshape(r_log, (-1, G))
    p2 = jnp.reshape(pi_logit, (-1, G))
    B = x2.shape[0]

    tb = _pick_block_rows(B, G)
    n_blocks = -(-B // tb)                     # cdiv
    B_pad = n_blocks * tb
    if B_pad != B:
        pad = ((0, B_pad - B), (0, 0))
        x2, m2, r2, p2 = (jnp.pad(a, pad) for a in (x2, m2, r2, p2))

    in_spec = pl.BlockSpec((tb, G), lambda i: (i, 0))
    cparams = pltpu.CompilerParams(
        dimension_semantics=("parallel",),
        vmem_limit_bytes=32 * 1024 * 1024,
    )

    if reduction is None:
        nll = pl.pallas_call(
            _zinb_elem_kernel,
            out_shape=jax.ShapeDtypeStruct((B_pad, G), jnp.float32),
            grid_spec=pltpu.PrefetchScalarGridSpec(
                num_scalar_prefetch=0,
                grid=(n_blocks,),
                in_specs=[in_spec, in_spec, in_spec, in_spec],
                out_specs=in_spec,
            ),
            compiler_params=cparams,
        )(x2, m2, r2, p2)
        return nll[:B].reshape(orig_shape)

    # Reduced modes: never write the (B, G) elementwise NLL to HBM; emit one
    # replicated partial sum per block instead.
    kern = functools.partial(_zinb_sum_kernel, block_rows=tb, valid_rows=B)
    partials = pl.pallas_call(
        kern,
        out_shape=jax.ShapeDtypeStruct((n_blocks * 8, 128), jnp.float32),
        grid_spec=pltpu.PrefetchScalarGridSpec(
            num_scalar_prefetch=0,
            grid=(n_blocks,),
            in_specs=[in_spec, in_spec, in_spec, in_spec],
            out_specs=pl.BlockSpec((8, 128), lambda i: (i, 0)),
        ),
        compiler_params=cparams,
    )(x2, m2, r2, p2)
    total = jnp.sum(partials[::8, 0])          # one replicated scalar per block
    if reduction == 'mean':
        return total / (B * G)                 # torch.mean(ret)
    return total / G                           # torch.mean(ret, dim=-1).sum()


# --------------------------------------------------------------------------
# Pure-JAX reference (sanity check only).
# --------------------------------------------------------------------------
def _ref_loss(x, m_log, r_log, pi, reduction='sum'):
    from jax.scipy.special import gammaln
    x = x.astype(jnp.float32)
    r = jnp.exp(r_log)
    log_rm = jnp.logaddexp(r_log, m_log)
    nb_log = (gammaln(x + r) - gammaln(r) - gammaln(x + 1.0)
              + r * (r_log - log_rm) + x * (m_log - log_rm))
    sp = jax.nn.softplus(pi)
    ll = jnp.where(x < 0.5, jnp.logaddexp(pi, nb_log) - sp, nb_log - sp)
    ret = -ll
    if reduction is None:
        return ret
    if reduction == 'mean':
        return jnp.mean(ret)
    return jnp.sum(jnp.mean(ret, axis=-1))


if __name__ == "__main__":
    key = jax.random.PRNGKey(0)
    kx, km, kr, kp = jax.random.split(key, 4)

    B, G = 16, 256  # cells x genes
    x = jax.random.randint(kx, (B, G), 0, 8).astype(jnp.float32)   # counts (with zeros)
    mean_log = jax.random.normal(km, (B, G), jnp.float32)
    r_log = 0.5 * jax.random.normal(kr, (B, G), jnp.float32)
    pi_logit = jax.random.normal(kp, (B, G), jnp.float32)

    out_sum = jax.block_until_ready(
        zinb_loss_log_ver(x, mean_log, r_log, pi_logit, reduction='sum'))
    out_mean = jax.block_until_ready(
        zinb_loss_log_ver(x, mean_log, r_log, pi_logit, reduction='mean'))
    out_none = jax.block_until_ready(
        zinb_loss_log_ver(x, mean_log, r_log, pi_logit, reduction=None))

    ref_sum = _ref_loss(x, mean_log, r_log, pi_logit, 'sum')
    ref_mean = _ref_loss(x, mean_log, r_log, pi_logit, 'mean')
    ref_none = _ref_loss(x, mean_log, r_log, pi_logit, None)

    if not np.allclose(np.asarray(out_sum), np.asarray(ref_sum), rtol=5e-3, atol=5e-2):
        raise AssertionError(f"sum mismatch: {out_sum} vs {ref_sum}")
    if not np.allclose(np.asarray(out_mean), np.asarray(ref_mean), rtol=5e-3, atol=5e-3):
        raise AssertionError(f"mean mismatch: {out_mean} vs {ref_mean}")
    if not np.allclose(np.asarray(out_none), np.asarray(ref_none), rtol=2e-3, atol=2e-3):
        raise AssertionError("elementwise mismatch")

    print("KERNEL_OK")
</pallas_src>

<mosaic_0001>
module attributes {stable_mosaic.version = 11 : i64} {
  func.func @_zinb_sum_kernel(%arg0: i32, %arg1: memref<16x256xf32, #tpu.memory_space<vmem>>, %arg2: memref<16x256xf32, #tpu.memory_space<vmem>>, %arg3: memref<16x256xf32, #tpu.memory_space<vmem>>, %arg4: memref<16x256xf32, #tpu.memory_space<vmem>>, %arg5: memref<8x128xf32, #tpu.memory_space<vmem>>) attributes {dimension_semantics = [#tpu.dimension_semantics<parallel>], iteration_bounds = array<i64: 1>, scalar_prefetch = 0 : i64, scratch_operands = 0 : i64, tpu.core_type = #tpu.core_type<tc>, window_params = [{transform_indices = @transform_0, window_bounds = array<i64: 16, 256>}, {transform_indices = @transform_1, window_bounds = array<i64: 16, 256>}, {transform_indices = @transform_2, window_bounds = array<i64: 16, 256>}, {transform_indices = @transform_3, window_bounds = array<i64: 16, 256>}, {transform_indices = @transform_4, window_bounds = array<i64: 8, 128>}]} {
    %c0 = arith.constant 0 : index
    %c0_0 = arith.constant 0 : index
    %0 = vector.load %arg1[%c0, %c0_0] : memref<16x256xf32, #tpu.memory_space<vmem>>, vector<16x256xf32>
    %c0_1 = arith.constant 0 : index
    %c0_2 = arith.constant 0 : index
    %1 = vector.load %arg2[%c0_1, %c0_2] : memref<16x256xf32, #tpu.memory_space<vmem>>, vector<16x256xf32>
    %c0_3 = arith.constant 0 : index
    %c0_4 = arith.constant 0 : index
    %2 = vector.load %arg3[%c0_3, %c0_4] : memref<16x256xf32, #tpu.memory_space<vmem>>, vector<16x256xf32>
    %c0_5 = arith.constant 0 : index
    %c0_6 = arith.constant 0 : index
    %3 = vector.load %arg4[%c0_5, %c0_6] : memref<16x256xf32, #tpu.memory_space<vmem>>, vector<16x256xf32>
    %4 = math.exp %2 : vector<16x256xf32>
    %5 = arith.maximumf %2, %1 : vector<16x256xf32>
    %6 = arith.subf %2, %1 : vector<16x256xf32>
    %7 = math.absf %6 : vector<16x256xf32>
    %cst = arith.constant 0.000000e+00 : f32
    %8 = vector.broadcast %cst : f32 to vector<16x256xf32>
    %9 = arith.subf %8, %7 : vector<16x256xf32>
    %10 = math.exp %9 : vector<16x256xf32>
    %cst_7 = arith.constant 1.000000e+00 : f32
    %11 = vector.broadcast %cst_7 : f32 to vector<16x256xf32>
    %12 = arith.addf %11, %10 : vector<16x256xf32>
    %13 = math.log %12 : vector<16x256xf32>
    %14 = arith.addf %5, %13 : vector<16x256xf32>
    %15 = arith.addf %0, %4 : vector<16x256xf32>
    %cst_8 = arith.constant 1.000000e+00 : f32
    %16 = vector.broadcast %cst_8 : f32 to vector<16x256xf32>
    %17 = arith.subf %15, %16 : vector<16x256xf32>
    %cst_9 = arith.constant 1.000000e+00 : f32
    %18 = vector.broadcast %cst_9 : f32 to vector<16x256xf32>
    %19 = arith.subf %4, %18 : vector<16x256xf32>
    %cst_10 = arith.constant 3.000000e+04 : f32
    %20 = vector.broadcast %cst_10 : f32 to vector<16x256xf32>
    %21 = arith.minimumf %17, %20 : vector<16x256xf32>
    %cst_11 = arith.constant 1.000000e+00 : f32
    %22 = vector.broadcast %cst_11 : f32 to vector<16x256xf32>
    %23 = arith.addf %21, %22 : vector<16x256xf32>
    %cst_12 = arith.constant 2.000000e+00 : f32
    %24 = vector.broadcast %cst_12 : f32 to vector<16x256xf32>
    %25 = arith.addf %21, %24 : vector<16x256xf32>
    %cst_13 = arith.constant 3.000000e+00 : f32
    %26 = vector.broadcast %cst_13 : f32 to vector<16x256xf32>
    %27 = arith.addf %21, %26 : vector<16x256xf32>
    %cst_14 = arith.constant 4.000000e+00 : f32
    %28 = vector.broadcast %cst_14 : f32 to vector<16x256xf32>
    %29 = arith.addf %21, %28 : vector<16x256xf32>
    %cst_15 = arith.constant 5.000000e+00 : f32
    %30 = vector.broadcast %cst_15 : f32 to vector<16x256xf32>
    %31 = arith.addf %21, %30 : vector<16x256xf32>
    %cst_16 = arith.constant 6.000000e+00 : f32
    %32 = vector.broadcast %cst_16 : f32 to vector<16x256xf32>
    %33 = arith.addf %21, %32 : vector<16x256xf32>
    %cst_17 = arith.constant 7.000000e+00 : f32
    %34 = vector.broadcast %cst_17 : f32 to vector<16x256xf32>
    %35 = arith.addf %21, %34 : vector<16x256xf32>
    %cst_18 = arith.constant 8.000000e+00 : f32
    %36 = vector.broadcast %cst_18 : f32 to vector<16x256xf32>
    %37 = arith.addf %21, %36 : vector<16x256xf32>
    %cst_19 = arith.constant 676.520386 : f32
    %38 = vector.broadcast %cst_19 : f32 to vector<16x256xf32>
    %39 = arith.mulf %38, %25 : vector<16x256xf32>
    %cst_20 = arith.constant -1259.13916 : f32
    %40 = vector.broadcast %cst_20 : f32 to vector<16x256xf32>
    %41 = arith.mulf %40, %23 : vector<16x256xf32>
    %42 = arith.addf %39, %41 : vector<16x256xf32>
    %cst_21 = arith.constant 771.323425 : f32
    %43 = vector.broadcast %cst_21 : f32 to vector<16x256xf32>
    %44 = arith.mulf %43, %29 : vector<16x256xf32>
    %cst_22 = arith.constant -176.615036 : f32
    %45 = vector.broadcast %cst_22 : f32 to vector<16x256xf32>
    %46 = arith.mulf %45, %27 : vector<16x256xf32>
    %47 = arith.addf %44, %46 : vector<16x256xf32>
    %cst_23 = arith.constant 12.5073433 : f32
    %48 = vector.broadcast %cst_23 : f32 to vector<16x256xf32>
    %49 = arith.mulf %48, %33 : vector<16x256xf32>
    %cst_24 = arith.constant -0.138571098 : f32
    %50 = vector.broadcast %cst_24 : f32 to vector<16x256xf32>
    %51 = arith.mulf %50, %31 : vector<16x256xf32>
    %52 = arith.addf %49, %51 : vector<16x256xf32>
    %cst_25 = arith.constant 9.98436917E-6 : f32
    %53 = vector.broadcast %cst_25 : f32 to vector<16x256xf32>
    %54 = arith.mulf %53, %37 : vector<16x256xf32>
    %cst_26 = arith.constant 1.50563267E-7 : f32
    %55 = vector.broadcast %cst_26 : f32 to vector<16x256xf32>
    %56 = arith.mulf %55, %35 : vector<16x256xf32>
    %57 = arith.addf %54, %56 : vector<16x256xf32>
    %58 = arith.mulf %23, %25 : vector<16x256xf32>
    %59 = arith.mulf %27, %29 : vector<16x256xf32>
    %60 = arith.mulf %31, %33 : vector<16x256xf32>
    %61 = arith.mulf %35, %37 : vector<16x256xf32>
    %62 = arith.mulf %42, %59 : vector<16x256xf32>
    %63 = arith.mulf %47, %58 : vector<16x256xf32>
    %64 = arith.addf %62, %63 : vector<16x256xf32>
    %65 = arith.mulf %52, %61 : vector<16x256xf32>
    %66 = arith.mulf %57, %60 : vector<16x256xf32>
    %67 = arith.addf %65, %66 : vector<16x256xf32>
    %68 = arith.mulf %58, %59 : vector<16x256xf32>
    %69 = arith.mulf %60, %61 : vector<16x256xf32>
    %70 = arith.mulf %64, %69 : vector<16x256xf32>
    %71 = arith.mulf %67, %68 : vector<16x256xf32>
    %72 = arith.addf %70, %71 : vector<16x256xf32>
    %73 = arith.mulf %68, %69 : vector<16x256xf32>
    %cst_27 = arith.constant 1.000000e+00 : f32
    %74 = vector.broadcast %cst_27 : f32 to vector<16x256xf32>
    %75 = arith.mulf %74, %73 : vector<16x256xf32>
    %76 = arith.addf %75, %72 : vector<16x256xf32>
    %cst_28 = arith.constant 3.000000e+04 : f32
    %77 = vector.broadcast %cst_28 : f32 to vector<16x256xf32>
    %78 = arith.minimumf %19, %77 : vector<16x256xf32>
    %cst_29 = arith.constant 1.000000e+00 : f32
    %79 = vector.broadcast %cst_29 : f32 to vector<16x256xf32>
    %80 = arith.addf %78, %79 : vector<16x256xf32>
    %cst_30 = arith.constant 2.000000e+00 : f32
    %81 = vector.broadcast %cst_30 : f32 to vector<16x256xf32>
    %82 = arith.addf %78, %81 : vector<16x256xf32>
    %cst_31 = arith.constant 3.000000e+00 : f32
    %83 = vector.broadcast %cst_31 : f32 to vector<16x256xf32>
    %84 = arith.addf %78, %83 : vector<16x256xf32>
    %cst_32 = arith.constant 4.000000e+00 : f32
    %85 = vector.broadcast %cst_32 : f32 to vector<16x256xf32>
    %86 = arith.addf %78, %85 : vector<16x256xf32>
    %cst_33 = arith.constant 5.000000e+00 : f32
    %87 = vector.broadcast %cst_33 : f32 to vector<16x256xf32>
    %88 = arith.addf %78, %87 : vector<16x256xf32>
    %cst_34 = arith.constant 6.000000e+00 : f32
    %89 = vector.broadcast %cst_34 : f32 to vector<16x256xf32>
    %90 = arith.addf %78, %89 : vector<16x256xf32>
    %cst_35 = arith.constant 7.000000e+00 : f32
    %91 = vector.broadcast %cst_35 : f32 to vector<16x256xf32>
    %92 = arith.addf %78, %91 : vector<16x256xf32>
    %cst_36 = arith.constant 8.000000e+00 : f32
    %93 = vector.broadcast %cst_36 : f32 to vector<16x256xf32>
    %94 = arith.addf %78, %93 : vector<16x256xf32>
    %cst_37 = arith.constant 676.520386 : f32
    %95 = vector.broadcast %cst_37 : f32 to vector<16x256xf32>
    %96 = arith.mulf %95, %82 : vector<16x256xf32>
    %cst_38 = arith.constant -1259.13916 : f32
    %97 = vector.broadcast %cst_38 : f32 to vector<16x256xf32>
    %98 = arith.mulf %97, %80 : vector<16x256xf32>
    %99 = arith.addf %96, %98 : vector<16x256xf32>
    %cst_39 = arith.constant 771.323425 : f32
    %100 = vector.broadcast %cst_39 : f32 to vector<16x256xf32>
    %101 = arith.mulf %100, %86 : vector<16x256xf32>
    %cst_40 = arith.constant -176.615036 : f32
    %102 = vector.broadcast %cst_40 : f32 to vector<16x256xf32>
    %103 = arith.mulf %102, %84 : vector<16x256xf32>
    %104 = arith.addf %101, %103 : vector<16x256xf32>
    %cst_41 = arith.constant 12.5073433 : f32
    %105 = vector.broadcast %cst_41 : f32 to vector<16x256xf32>
    %106 = arith.mulf %105, %90 : vector<16x256xf32>
    %cst_42 = arith.constant -0.138571098 : f32
    %107 = vector.broadcast %cst_42 : f32 to vector<16x256xf32>
    %108 = arith.mulf %107, %88 : vector<16x256xf32>
    %109 = arith.addf %106, %108 : vector<16x256xf32>
    %cst_43 = arith.constant 9.98436917E-6 : f32
    %110 = vector.broadcast %cst_43 : f32 to vector<16x256xf32>
    %111 = arith.mulf %110, %94 : vector<16x256xf32>
    %cst_44 = arith.constant 1.50563267E-7 : f32
    %112 = vector.broadcast %cst_44 : f32 to vector<16x256xf32>
    %113 = arith.mulf %112, %92 : vector<16x256xf32>
    %114 = arith.addf %111, %113 : vector<16x256xf32>
    %115 = arith.mulf %80, %82 : vector<16x256xf32>
    %116 = arith.mulf %84, %86 : vector<16x256xf32>
    %117 = arith.mulf %88, %90 : vector<16x256xf32>
    %118 = arith.mulf %92, %94 : vector<16x256xf32>
    %119 = arith.mulf %99, %116 : vector<16x256xf32>
    %120 = arith.mulf %104, %115 : vector<16x256xf32>
    %121 = arith.addf %119, %120 : vector<16x256xf32>
    %122 = arith.mulf %109, %118 : vector<16x256xf32>
    %123 = arith.mulf %114, %117 : vector<16x256xf32>
    %124 = arith.addf %122, %123 : vector<16x256xf32>
    %125 = arith.mulf %115, %116 : vector<16x256xf32>
    %126 = arith.mulf %117, %118 : vector<16x256xf32>
    %127 = arith.mulf %121, %126 : vector<16x256xf32>
    %128 = arith.mulf %124, %125 : vector<16x256xf32>
    %129 = arith.addf %127, %128 : vector<16x256xf32>
    %130 = arith.mulf %125, %126 : vector<16x256xf32>
    %cst_45 = arith.constant 1.000000e+00 : f32
    %131 = vector.broadcast %cst_45 : f32 to vector<16x256xf32>
    %132 = arith.mulf %131, %130 : vector<16x256xf32>
    %133 = arith.addf %132, %129 : vector<16x256xf32>
    %cst_46 = arith.constant 3.000000e+04 : f32
    %134 = vector.broadcast %cst_46 : f32 to vector<16x256xf32>
    %135 = arith.minimumf %0, %134 : vector<16x256xf32>
    %cst_47 = arith.constant 1.000000e+00 : f32
    %136 = vector.broadcast %cst_47 : f32 to vector<16x256xf32>
    %137 = arith.addf %135, %136 : vector<16x256xf32>
    %cst_48 = arith.constant 2.000000e+00 : f32
    %138 = vector.broadcast %cst_48 : f32 to vector<16x256xf32>
    %139 = arith.addf %135, %138 : vector<16x256xf32>
    %cst_49 = arith.constant 3.000000e+00 : f32
    %140 = vector.broadcast %cst_49 : f32 to vector<16x256xf32>
    %141 = arith.addf %135, %140 : vector<16x256xf32>
    %cst_50 = arith.constant 4.000000e+00 : f32
    %142 = vector.broadcast %cst_50 : f32 to vector<16x256xf32>
    %143 = arith.addf %135, %142 : vector<16x256xf32>
    %cst_51 = arith.constant 5.000000e+00 : f32
    %144 = vector.broadcast %cst_51 : f32 to vector<16x256xf32>
    %145 = arith.addf %135, %144 : vector<16x256xf32>
    %cst_52 = arith.constant 6.000000e+00 : f32
    %146 = vector.broadcast %cst_52 : f32 to vector<16x256xf32>
    %147 = arith.addf %135, %146 : vector<16x256xf32>
    %cst_53 = arith.constant 7.000000e+00 : f32
    %148 = vector.broadcast %cst_53 : f32 to vector<16x256xf32>
    %149 = arith.addf %135, %148 : vector<16x256xf32>
    %cst_54 = arith.constant 8.000000e+00 : f32
    %150 = vector.broadcast %cst_54 : f32 to vector<16x256xf32>
    %151 = arith.addf %135, %150 : vector<16x256xf32>
    %cst_55 = arith.constant 676.520386 : f32
    %152 = vector.broadcast %cst_55 : f32 to vector<16x256xf32>
    %153 = arith.mulf %152, %139 : vector<16x256xf32>
    %cst_56 = arith.constant -1259.13916 : f32
    %154 = vector.broadcast %cst_56 : f32 to vector<16x256xf32>
    %155 = arith.mulf %154, %137 : vector<16x256xf32>
    %156 = arith.addf %153, %155 : vector<16x256xf32>
    %cst_57 = arith.constant 771.323425 : f32
    %157 = vector.broadcast %cst_57 : f32 to vector<16x256xf32>
    %158 = arith.mulf %157, %143 : vector<16x256xf32>
    %cst_58 = arith.constant -176.615036 : f32
    %159 = vector.broadcast %cst_58 : f32 to vector<16x256xf32>
    %160 = arith.mulf %159, %141 : vector<16x256xf32>
    %161 = arith.addf %158, %160 : vector<16x256xf32>
    %cst_59 = arith.constant 12.5073433 : f32
    %162 = vector.broadcast %cst_59 : f32 to vector<16x256xf32>
    %163 = arith.mulf %162, %147 : vector<16x256xf32>
    %cst_60 = arith.constant -0.138571098 : f32
    %164 = vector.broadcast %cst_60 : f32 to vector<16x256xf32>
    %165 = arith.mulf %164, %145 : vector<16x256xf32>
    %166 = arith.addf %163, %165 : vector<16x256xf32>
    %cst_61 = arith.constant 9.98436917E-6 : f32
    %167 = vector.broadcast %cst_61 : f32 to vector<16x256xf32>
    %168 = arith.mulf %167, %151 : vector<16x256xf32>
    %cst_62 = arith.constant 1.50563267E-7 : f32
    %169 = vector.broadcast %cst_62 : f32 to vector<16x256xf32>
    %170 = arith.mulf %169, %149 : vector<16x256xf32>
    %171 = arith.addf %168, %170 : vector<16x256xf32>
    %172 = arith.mulf %137, %139 : vector<16x256xf32>
    %173 = arith.mulf %141, %143 : vector<16x256xf32>
    %174 = arith.mulf %145, %147 : vector<16x256xf32>
    %175 = arith.mulf %149, %151 : vector<16x256xf32>
    %176 = arith.mulf %156, %173 : vector<16x256xf32>
    %177 = arith.mulf %161, %172 : vector<16x256xf32>
    %178 = arith.addf %176, %177 : vector<16x256xf32>
    %179 = arith.mulf %166, %175 : vector<16x256xf32>
    %180 = arith.mulf %171, %174 : vector<16x256xf32>
    %181 = arith.addf %179, %180 : vector<16x256xf32>
    %182 = arith.mulf %172, %173 : vector<16x256xf32>
    %183 = arith.mulf %174, %175 : vector<16x256xf32>
    %184 = arith.mulf %178, %183 : vector<16x256xf32>
    %185 = arith.mulf %181, %182 : vector<16x256xf32>
    %186 = arith.addf %184, %185 : vector<16x256xf32>
    %187 = arith.mulf %182, %183 : vector<16x256xf32>
    %cst_63 = arith.constant 1.000000e+00 : f32
    %188 = vector.broadcast %cst_63 : f32 to vector<16x256xf32>
    %189 = arith.mulf %188, %187 : vector<16x256xf32>
    %190 = arith.addf %189, %186 : vector<16x256xf32>
    %191 = arith.divf %76, %73 : vector<16x256xf32>
    %192 = arith.divf %130, %133 : vector<16x256xf32>
    %193 = arith.mulf %191, %192 : vector<16x256xf32>
    %194 = arith.divf %187, %190 : vector<16x256xf32>
    %195 = arith.mulf %193, %194 : vector<16x256xf32>
    %cst_64 = arith.constant 5.000000e-01 : f32
    %196 = vector.broadcast %cst_64 : f32 to vector<16x256xf32>
    %197 = arith.addf %17, %196 : vector<16x256xf32>
    %cst_65 = arith.constant 7.500000e+00 : f32
    %198 = vector.broadcast %cst_65 : f32 to vector<16x256xf32>
    %199 = arith.addf %17, %198 : vector<16x256xf32>
    %200 = math.log %199 : vector<16x256xf32>
    %201 = arith.mulf %197, %200 : vector<16x256xf32>
    %cst_66 = arith.constant 6.58106136 : f32
    %202 = vector.broadcast %cst_66 : f32 to vector<16x256xf32>
    %203 = arith.addf %202, %201 : vector<16x256xf32>
    %cst_67 = arith.constant 5.000000e-01 : f32
    %204 = vector.broadcast %cst_67 : f32 to vector<16x256xf32>
    %205 = arith.addf %19, %204 : vector<16x256xf32>
    %cst_68 = arith.constant 7.500000e+00 : f32
    %206 = vector.broadcast %cst_68 : f32 to vector<16x256xf32>
    %207 = arith.addf %19, %206 : vector<16x256xf32>
    %208 = math.log %207 : vector<16x256xf32>
    %209 = arith.mulf %205, %208 : vector<16x256xf32>
    %210 = arith.subf %203, %209 : vector<16x256xf32>
    %cst_69 = arith.constant 5.000000e-01 : f32
    %211 = vector.broadcast %cst_69 : f32 to vector<16x256xf32>
    %212 = arith.addf %0, %211 : vector<16x256xf32>
    %cst_70 = arith.constant 7.500000e+00 : f32
    %213 = vector.broadcast %cst_70 : f32 to vector<16x256xf32>
    %214 = arith.addf %0, %213 : vector<16x256xf32>
    %215 = math.log %214 : vector<16x256xf32>
    %216 = arith.mulf %212, %215 : vector<16x256xf32>
    %217 = arith.subf %210, %216 : vector<16x256xf32>
    %218 = math.log %195 : vector<16x256xf32>
    %219 = arith.addf %217, %218 : vector<16x256xf32>
    %220 = arith.subf %2, %14 : vector<16x256xf32>
    %221 = arith.mulf %4, %220 : vector<16x256xf32>
    %222 = arith.addf %219, %221 : vector<16x256xf32>
    %223 = arith.subf %1, %14 : vector<16x256xf32>
    %224 = arith.mulf %0, %223 : vector<16x256xf32>
    %225 = arith.addf %222, %224 : vector<16x256xf32>
    %cst_71 = arith.constant 5.000000e-01 : f32
    %226 = vector.broadcast %cst_71 : f32 to vector<16x256xf32>
    %227 = arith.cmpf olt, %0, %226 : vector<16x256xf32>
    %228 = arith.maximumf %3, %225 : vector<16x256xf32>
    %229 = arith.subf %3, %225 : vector<16x256xf32>
    %230 = math.absf %229 : vector<16x256xf32>
    %cst_72 = arith.constant 0.000000e+00 : f32
    %231 = vector.broadcast %cst_72 : f32 to vector<16x256xf32>
    %232 = arith.subf %231, %230 : vector<16x256xf32>
    %233 = math.exp %232 : vector<16x256xf32>
    %cst_73 = arith.constant 1.000000e+00 : f32
    %234 = vector.broadcast %cst_73 : f32 to vector<16x256xf32>
    %235 = arith.addf %234, %233 : vector<16x256xf32>
    %236 = math.log %235 : vector<16x256xf32>
    %237 = arith.addf %228, %236 : vector<16x256xf32>
    %238 = arith.select %227, %237, %225 : vector<16x256xi1>, vector<16x256xf32>
    %cst_74 = arith.constant 0.000000e+00 : f32
    %239 = vector.broadcast %cst_74 : f32 to vector<16x256xf32>
    %240 = arith.maximumf %3, %239 : vector<16x256xf32>
    %241 = math.absf %3 : vector<16x256xf32>
    %cst_75 = arith.constant 0.000000e+00 : f32
    %242 = vector.broadcast %cst_75 : f32 to vector<16x256xf32>
    %243 = arith.subf %242, %241 : vector<16x256xf32>
    %244 = math.exp %243 : vector<16x256xf32>
    %cst_76 = arith.constant 1.000000e+00 : f32
    %245 = vector.broadcast %cst_76 : f32 to vector<16x256xf32>
    %246 = arith.addf %245, %244 : vector<16x256xf32>
    %247 = math.log %246 : vector<16x256xf32>
    %248 = arith.addf %240, %247 : vector<16x256xf32>
    %249 = arith.subf %238, %248 : vector<16x256xf32>
    %cst_77 = arith.constant 0.000000e+00 : f32
    %250 = vector.broadcast %cst_77 : f32 to vector<16x256xf32>
    %251 = arith.subf %250, %249 : vector<16x256xf32>
    %cst_78 = arith.constant dense<0.000000e+00> : vector<256xf32>
    %252 = vector.multi_reduction <add>, %251, %cst_78 [0] : vector<16x256xf32> to vector<256xf32>
    %253 = vector.shape_cast %252 : vector<256xf32> to vector<1x256xf32>
    %cst_79 = arith.constant dense<0.000000e+00> : vector<1xf32>
    %254 = vector.multi_reduction <add>, %253, %cst_79 [1] : vector<1x256xf32> to vector<1xf32>
    %255 = vector.shape_cast %254 : vector<1xf32> to vector<1x1xf32>
    %cst_80 = arith.constant 0.000000e+00 : f32
    %256 = vector.broadcast %cst_80 : f32 to vector<8x128xf32>
    %257 = vector.broadcast %255 : vector<1x1xf32> to vector<8x128xf32>
    %258 = arith.addf %256, %257 : vector<8x128xf32>
    %c0_81 = arith.constant 0 : index
    %c0_82 = arith.constant 0 : index
    %259 = vector.load %arg5[%c0_81, %c0_82] : memref<8x128xf32, #tpu.memory_space<vmem>>, vector<8x128xf32>
    tpu.vector_store %arg5[%c0_81, %c0_82], %258 {strides = array<i32>} : memref<8x128xf32, #tpu.memory_space<vmem>>, vector<8x128xf32>,
    return
  }
  func.func @transform_0(%arg0: i32) -> (i32, i32) {
    %c0_i32 = arith.constant 0 : i32
    %c0_i32_0 = arith.constant 0 : i32
    return %arg0, %c0_i32 : i32, i32
  }
  func.func @transform_1(%arg0: i32) -> (i32, i32) {
    %c0_i32 = arith.constant 0 : i32
    %c0_i32_0 = arith.constant 0 : i32
    return %arg0, %c0_i32 : i32, i32
  }
  func.func @transform_2(%arg0: i32) -> (i32, i32) {
    %c0_i32 = arith.constant 0 : i32
    %c0_i32_0 = arith.constant 0 : i32
    return %arg0, %c0_i32 : i32, i32
  }
  func.func @transform_3(%arg0: i32) -> (i32, i32) {
    %c0_i32 = arith.constant 0 : i32
    %c0_i32_0 = arith.constant 0 : i32
    return %arg0, %c0_i32 : i32, i32
  }
  func.func @transform_4(%arg0: i32) -> (i32, i32) {
    %c0_i32 = arith.constant 0 : i32
    %c0_i32_0 = arith.constant 0 : i32
    return %arg0, %c0_i32 : i32, i32
  }
}

</mosaic_0001>

<bundles_post_ra>
// kernel: tpu_custom_call.1
= control target key start
LH: loop header
LB: loop body
LE: loop exit
PB: predicated region body
PF: predicated region fallthrough
CT: control target
= control target key end

     0   :  { %9 = vsyncpa [#allocation3], 0  ;;  %s1958_s0 = inlined_call_operand.hbm [shape: f32[16,256], index: 0, kind: input, shape index: {}]   ;;  %s1959_s1 = inlined_call_operand.hbm [shape: f32[16,256], index: 1, kind: input, shape index: {}]   ;;  %s1960_s2 = inlined_call_operand.hbm [shape: f32[16,256], index: 2, kind: input, shape index: {}]   ;;  %s1961_s3 = inlined_call_operand.hbm [shape: f32[16,256], index: 3, kind: input, shape index: {}]   ;;  %s1962_s4 = inlined_call_operand.hbm [shape: f32[8,128], index: 4, kind: output, shape index: {}]  }
   0x1   :  { %10 = vsyncpa [#allocation6], 0 }
   0x2   :  { %11 = vsyncpa [#allocation9], 0 }
   0x3   :  { %12 = vsyncpa [#allocation4], 0  ;;  %s1120_s15 = smov [#allocation5]   ;;  %s1121_s17 = smov [#allocation2]  }
   0x4   :  { %s30_s16 = sshll.u32 %s1120_s15, 4  ;;  %s18_s18 = sshll.u32 %s1121_s17, 4  ;;  %s31_s16 = int_to_ptr.vmem [resolvable:$true] %s30_s16  ;;  %s19_s18 = int_to_ptr.vmem [resolvable:$true] %s18_s18 }
   0x5   :  { %s1020_s19 = scalar_lea.vmem %s31_s16, 512  ;;  %p1025_p1 = scmp.lt.s32.totalorder %s31_s16, %s31_s16 }
   0x6   :  { %p1021_p0 = scmp.ne.s32.totalorder %s31_s16, %s1020_s19  ;;  %p1026_p2 = scmp.lt.s32.totalorder %s1020_s19, %s1020_s19 }
   0x8   :  { %p1027_p3 = por %p1026_p2, %p1025_p1 }
   0xa   :  { %p1028_p4 = pnand %p1027_p3, %p1021_p0 }
   0xc   :  { %1031 = shalt.err (!%p1028_p4)
}
   0xd   :  { %s1122_s20 = smov 256   ;;  %s1123_s21 = smov 16  }
   0xe   :  { %36 = dma.hbm_to_vmem [thread:$0]  %s1959_s1, 512, %s31_s16, [#allocation6], %s1122_s20, %s1122_s20, %s1123_s21  }
   0xf   :  { %s1040_s24 = scalar_lea.vmem %s19_s18, 512  ;;  %p1045_p6 = scmp.lt.s32.totalorder %s19_s18, %s19_s18 }
  0x10   :  { %p1041_p5 = scmp.ne.s32.totalorder %s19_s18, %s1040_s24  ;;  %p1046_p7 = scmp.lt.s32.totalorder %s1040_s24, %s1040_s24 }
  0x12   :  { %p1047_p8 = por %p1046_p7, %p1045_p6 }
  0x14   :  { %p1048_p9 = pnand %p1047_p8, %p1041_p5 }
  0x16   :  { %1051 = shalt.err (!%p1048_p9)
}
  0x17   :  { %24 = dma.hbm_to_vmem [thread:$0]  %s1958_s0, 512, %s19_s18, [#allocation3], %s1122_s20, %s1122_s20, %s1123_s21  }
  0x18   :  { %s1124_s27 = smov [#allocation7]   ;;  %s1125_s29 = smov [#allocation8]  }
  0x19   :  { %s42_s28 = sshll.u32 %s1124_s27, 4  ;;  %s54_s30 = sshll.u32 %s1125_s29, 4  ;;  %s43_s28 = int_to_ptr.vmem [resolvable:$true] %s42_s28  ;;  %s55_s30 = int_to_ptr.vmem [resolvable:$true] %s54_s30 }
  0x1a   :  { %s1060_s1 = scalar_lea.vmem %s43_s28, 512  ;;  %p1065_p11 = scmp.lt.s32.totalorder %s43_s28, %s43_s28 }
  0x1b   :  { %p1061_p10 = scmp.ne.s32.totalorder %s43_s28, %s1060_s1  ;;  %p1066_p12 = scmp.lt.s32.totalorder %s1060_s1, %s1060_s1 }
  0x1d   :  { %p1067_p13 = por %p1066_p12, %p1065_p11 }
  0x1f   :  { %p1068_p0 = pnand %p1067_p13, %p1061_p10 }
  0x21   :  { %1071 = shalt.err (!%p1068_p0)
}
  0x22   :  { %48 = dma.hbm_to_vmem [thread:$0]  %s1960_s2, 512, %s43_s28, [#allocation6], %s1122_s20, %s1122_s20, %s1123_s21  }
  0x23   :  { %s1080_s0 = scalar_lea.vmem %s55_s30, 512  ;;  %p1085_p2 = scmp.lt.s32.totalorder %s55_s30, %s55_s30 }
  0x24   :  { %p1081_p1 = scmp.ne.s32.totalorder %s55_s30, %s1080_s0  ;;  %p1086_p3 = scmp.lt.s32.totalorder %s1080_s0, %s1080_s0 }
  0x26   :  { %p1087_p4 = por %p1086_p3, %p1085_p2 }
  0x28   :  { %p1088_p5 = pnand %p1087_p4, %p1081_p1 }
  0x2a   :  { %1091 = shalt.err (!%p1088_p5)
}
  0x2b   :  { %60 = dma.hbm_to_vmem [thread:$0]  %s1961_s3, 512, %s55_s30, [#allocation9], %s1122_s20, %s1122_s20, %s1123_s21  }
  0x2c   :  { %1112 = dma.done.wait [#allocation3], 512  }
  0x2d   :  { %1113 = vsyncadd [#allocation3], 4294966784 }
  0x2e   :  { %1114 = dma.done.wait [#allocation6], 1024  }
  0x2f   :  { %1115 = vsyncadd [#allocation6], 4294966272 }
  0x30   :  { %1116 = dma.done.wait [#allocation9], 512  }
  0x31   :  { %1117 = vsyncadd [#allocation9], 4294966784  ;;  %v1176_v0 = vld [vmem:[#allocation5] sm:$0xff]  ;;  %v1178_v1 = vld [vmem:[#allocation5 + $0x8] sm:$0xff]  ;;  %s1126_s2 = smov [#allocation10]  }
  0x32   :  { %2055 = vst [vmem:[#allocation15_spill] sm:$0xff] %v1176_v0  ;;  %2056 = vst [vmem:[#allocation16_spill] sm:$0xff] %v1178_v1  ;;  %v1180_v2 = vld [vmem:[#allocation7] sm:$0xff]  ;;  %v1182_v3 = vld [vmem:[#allocation5 + $0x10] sm:$0xff]  ;;  %s862_s3 = sshll.u32 %s1126_s2, 4  ;;  %s863_s3 = int_to_ptr.vmem [resolvable:$true] %s862_s3 }
  0x33   :  { %2057 = vst [vmem:[#allocation17_spill] sm:$0xff] %v1180_v2  ;;  %2058 = vst [vmem:[#allocation18_spill] sm:$0xff] %v1182_v3  ;;  %v1184_v4 = vld [vmem:[#allocation7 + $0x8] sm:$0xff]  ;;  %v101_v5 = vsub.f32 %v1180_v2, %v1176_v0  ;;  %v1188_v6 = vld [vmem:[#allocation5 + $0x18] sm:$0xff]  ;;  %v89_v9 = vmul.f32 1.442695, %v1180_v2  ;;  %p1097_p7 = scmp.lt.s32.totalorder %s863_s3, %s863_s3 }
  0x34   :  { %2059 = vst [vmem:[#allocation19_spill] sm:$0xff] %v1184_v4  ;;  %2060 = vst [vmem:[#allocation20_spill] sm:$0xff] %v1188_v6  ;;  %v1190_v7 = vld [vmem:[#allocation7 + $0x10] sm:$0xff]  ;;  %v1192_v8 = vld [vmem:[#allocation7 + $0x18] sm:$0xff]  ;;  %v102_v10 = vsub.f32 %v1184_v4, %v1178_v1  ;;  %v91_v11 = vmul.f32 1.442695, %v1184_v4 }
  0x35   :  { %2061 = vst [vmem:[#allocation21_spill] sm:$0xff] %v1190_v7  ;;  %2062 = vst [vmem:[#allocation22_spill] sm:$0xff] %v1192_v8  ;;  %v103_v12 = vsub.f32 %v1190_v7, %v1182_v3  ;;  %v105_v13 = vand.u32 2147483647, %v101_v5  ;;  %v93_v14 = vmul.f32 1.442695, %v1190_v7  ;;  %v104_v15 = vsub.f32 %v1192_v8, %v1188_v6 }
  0x36   :  { %v106_v16 = vand.u32 2147483647, %v102_v10  ;;  %v95_v17 = vmul.f32 1.442695, %v1192_v8  ;;  %888 = vpow2.f32 %v89_v9  ;;  %v73_v23 = vld [vmem:[#allocation2] sm:$0xff]  ;;  %v74_v24 = vld [vmem:[#allocation2 + $0x8] sm:$0xff] }
  0x37   :  { %v107_v18 = vand.u32 2147483647, %v103_v12  ;;  %v109_v19 = vsub.f32 0.0, %v105_v13  ;;  %890 = vpow2.f32 %v91_v11  ;;  %v108_v21 = vand.u32 2147483647, %v104_v15  ;;  %v75_v26 = vld [vmem:[#allocation2 + $0x10] sm:$0xff] }
  0x38   :  { %v110_v20 = vsub.f32 0.0, %v106_v16  ;;  %892 = vpow2.f32 %v93_v14  ;;  %v76_v27 = vld [vmem:[#allocation2 + $0x18] sm:$0xff]  ;;  %v453_v31 = vmin.f32 %v73_v23, 30000.0  ;;  %v454_v32 = vmin.f32 %v74_v24, 30000.0  ;;  %s1092_s9 = scalar_lea.vmem %s863_s3, 128 }
  0x39   :  { %v111_v22 = vsub.f32 0.0, %v107_v18  ;;  %894 = vpow2.f32 %v95_v17  ;;  %v113_v25 = vmul.f32 1.442695, %v109_v19  ;;  %v112_v29 = vsub.f32 0.0, %v108_v21  ;;  %p1093_p6 = scmp.ne.s32.totalorder %s863_s3, %s1092_s9  ;;  %p1098_p8 = scmp.lt.s32.totalorder %s1092_s9, %s1092_s9 }
  0x3a   :  { %v115_v28 = vmul.f32 1.442695, %v110_v20  ;;  %v455_v33 = vmin.f32 %v75_v26, 30000.0  ;;  %v456_v34 = vmin.f32 %v76_v27, 30000.0  ;;  %v1206_v37 = vadd.f32 1.0, %v453_v31 }
  0x3b   :  { %v117_v30 = vmul.f32 1.442695, %v111_v22  ;;  %896 = vpow2.f32 %v113_v25  ;;  %v119_v36 = vmul.f32 1.442695, %v112_v29  ;;  %v1214_v41 = vadd.f32 1.0, %v454_v32  ;;  %p1099_p9 = por %p1098_p8, %p1097_p7 }
  0x3c   :  { %898 = vpow2.f32 %v115_v28  ;;  %2063 = vst [vmem:[#allocation23_spill] sm:$0xff] %v1206_v37  ;;  %v1216_v42 = vadd.f32 1.0, %v455_v33  ;;  %v1218_v43 = vadd.f32 1.0, %v456_v34  ;;  %v1220_v44 = vadd.f32 2.0, %v453_v31 }
  0x3d   :  { %900 = vpow2.f32 %v117_v30  ;;  %2064 = vst [vmem:[#allocation24_spill] sm:$0xff] %v1214_v41  ;;  %v1222_v45 = vadd.f32 2.0, %v454_v32  ;;  %v1226_v47 = vadd.f32 2.0, %v455_v33  ;;  %v1228_v48 = vadd.f32 2.0, %v456_v34  ;;  %p1100_p10 = pnand %p1099_p9, %p1093_p6 }
  0x3e   :  { %2065 = vst [vmem:[#allocation25_spill] sm:$0xff] %v1216_v42  ;;  %2066 = vst [vmem:[#allocation26_spill] sm:$0xff] %v1218_v43  ;;  %v1230_v49 = vadd.f32 3.0, %v453_v31  ;;  %v1232_v50 = vadd.f32 3.0, %v454_v32  ;;  %902 = vpow2.f32 %v119_v36  ;;  %v1236_v52 = vadd.f32 3.0, %v455_v33 }
  0x3f   :  { %2067 = vst [vmem:[#allocation27_spill] sm:$0xff] %v1220_v44  ;;  %2068 = vst [vmem:[#allocation28_spill] sm:$0xff] %v1222_v45  ;;  %v1238_v53 = vadd.f32 3.0, %v456_v34  ;;  %v1240_v54 = vadd.f32 4.0, %v453_v31  ;;  %v1246_v58 = vadd.f32 4.0, %v454_v32  ;;  %v1248_v59 = vadd.f32 4.0, %v455_v33 }
  0x40   :  { %2070 = vst [vmem:[#allocation30_spill] sm:$0xff] %v1226_v47  ;;  %2071 = vst [vmem:[#allocation31_spill] sm:$0xff] %v1228_v48  ;;  %v1253_v62 = vadd.f32 4.0, %v456_v34  ;;  %v1255_v63 = vadd.f32 5.0, %v453_v31  ;;  %v1257_v5 = vadd.f32 5.0, %v454_v32  ;;  %v1260_v10 = vadd.f32 5.0, %v455_v33 }
  0x41   :  { %2072 = vst [vmem:[#allocation32_spill] sm:$0xff] %v1230_v49  ;;  %2073 = vst [vmem:[#allocation33_spill] sm:$0xff] %v1232_v50  ;;  %v1262_v11 = vadd.f32 5.0, %v456_v34  ;;  %v1264_v12 = vadd.f32 6.0, %v453_v31  ;;  %v1272_v15 = vadd.f32 6.0, %v454_v32  ;;  %v1274_v16 = vadd.f32 6.0, %v455_v33 }
  0x42   :  { %2075 = vst [vmem:[#allocation35_spill] sm:$0xff] %v1236_v52  ;;  %2076 = vst [vmem:[#allocation36_spill] sm:$0xff] %v1238_v53  ;;  %v1280_v19 = vadd.f32 6.0, %v456_v34  ;;  %v1282_v20 = vadd.f32 7.0, %v453_v31  ;;  %v1286_v22 = vadd.f32 7.0, %v454_v32  ;;  %v1297_v28 = vadd.f32 8.0, %v453_v31 }
  0x43   :  { %v1224_v46 = vpop.eup %888  ;;  %2077 = vst [vmem:[#allocation37_spill] sm:$0xff] %v1240_v54  ;;  %2079 = vst [vmem:[#allocation39_spill] sm:$0xff] %v1246_v58  ;;  %v1299_v29 = vadd.f32 8.0, %v454_v32  ;;  %v1314_v39 = vadd.f32 8.0, %v456_v34  ;;  %v1317_v32 = vmul.f32 676.5204, %v1220_v44 }
  0x44   :  { %2069 = vst [vmem:[#allocation29_spill] sm:$0xff] %v1224_v46  ;;  %v1234_v51 = vpop.eup %890  ;;  %v137_v56 = vadd.f32 %v1224_v46, %v73_v23  ;;  %2080 = vst [vmem:[#allocation40_spill] sm:$0xff] %v1248_v59  ;;  %v1267_v13 = vadd.f32 -1.0, %v1224_v46  ;;  %v1288_v23 = vadd.f32 7.0, %v455_v33 }
  0x45   :  { %2074 = vst [vmem:[#allocation34_spill] sm:$0xff] %v1234_v51  ;;  %v1242_v55 = vpop.eup %892  ;;  %v138_v57 = vadd.f32 %v1234_v51, %v74_v24  ;;  %2082 = vst [vmem:[#allocation42_spill] sm:$0xff] %v1253_v62  ;;  %v1270_v14 = vadd.f32 -1.0, %v1234_v51  ;;  %v1290_v24 = vadd.f32 7.0, %v456_v34  ;;  %v1331_v34 = vmul.f32 676.5204, %v1228_v48 }
  0x46   :  { %2078 = vst [vmem:[#allocation38_spill] sm:$0xff] %v1242_v55  ;;  %v1250_v60 = vpop.eup %894  ;;  %v139_v61 = vadd.f32 %v1242_v55, %v75_v26  ;;  %2083 = vst [vmem:[#allocation43_spill] sm:$0xff] %v1255_v63  ;;  %v1276_v17 = vadd.f32 -1.0, %v137_v56  ;;  %v1305_v56 = vmin.f32 %v1267_v13, 30000.0 }
  0x47   :  { %2081 = vst [vmem:[#allocation41_spill] sm:$0xff] %v1250_v60  ;;  %2084 = vst [vmem:[#allocation44_spill] sm:$0xff] %v1257_v5  ;;  %v140_v9 = vadd.f32 %v1250_v60, %v76_v27  ;;  %v1278_v18 = vadd.f32 -1.0, %v138_v57  ;;  %v1295_v27 = vadd.f32 -1.0, %v1242_v55  ;;  %v1302_v36 = vadd.f32 -1.0, %v1250_v60 }
  0x48   :  { %2085 = vst [vmem:[#allocation45_spill] sm:$0xff] %v1260_v10  ;;  %2086 = vst [vmem:[#allocation46_spill] sm:$0xff] %v1262_v11  ;;  %v1284_v21 = vadd.f32 -1.0, %v139_v61  ;;  %v897_v25 = vpop.eup %896  ;;  %v1308_v57 = vmin.f32 %v1270_v14, 30000.0  ;;  %v1310_v61 = vadd.f32 8.0, %v455_v33  ;;  %v149_v40 = vmin.f32 %v1276_v17, 30000.0 }
  0x49   :  { %2087 = vst [vmem:[#allocation47_spill] sm:$0xff] %v1264_v12  ;;  %2088 = vst [vmem:[#allocation48_spill] sm:$0xff] %v1267_v13  ;;  %v1292_v26 = vadd.f32 -1.0, %v140_v9  ;;  %v899_v30 = vpop.eup %898  ;;  %v150_v31 = vmin.f32 %v1278_v18, 30000.0  ;;  %v121_v38 = vadd.f32 1.0, %v897_v25  ;;  %v1328_v46 = vmin.f32 %v1295_v27, 30000.0 }
  0x4a   :  { %2089 = vst [vmem:[#allocation49_spill] sm:$0xff] %v1270_v14  ;;  %2090 = vst [vmem:[#allocation50_spill] sm:$0xff] %v1272_v15  ;;  %v901_v9 = vpop.eup %900  ;;  %v151_v35 = vmin.f32 %v1284_v21, 30000.0  ;;  %v1321_v60 = vmul.f32 676.5204, %v1222_v45  ;;  %v122_v33 = vadd.f32 1.0, %v899_v30 }
  0x4b   :  { %2091 = vst [vmem:[#allocation51_spill] sm:$0xff] %v1274_v16  ;;  %2092 = vst [vmem:[#allocation52_spill] sm:$0xff] %v1276_v17  ;;  %v1324_v55 = vmul.f32 676.5204, %v1226_v47  ;;  %v152_v51 = vmin.f32 %v1292_v26, 30000.0  ;;  %v123_v6 = vadd.f32 1.0, %v901_v9  ;;  %v903_v3 = vpop.eup %902  ;;  %904 = vlog2.f32 %v121_v38 }
  0x4c   :  { %2093 = vst [vmem:[#allocation53_spill] sm:$0xff] %v1278_v18  ;;  %2094 = vst [vmem:[#allocation54_spill] sm:$0xff] %v1280_v19  ;;  %v1334_v25 = vmin.f32 %v1302_v36, 30000.0  ;;  %v1337_v8 = vadd.f32 1.0, %v1305_v56  ;;  %v1340_v14 = vadd.f32 1.0, %v1308_v57  ;;  %v153_v30 = vadd.f32 1.0, %v149_v40 }
  0x4d   :  { %2095 = vst [vmem:[#allocation55_spill] sm:$0xff] %v1282_v20  ;;  %2096 = vst [vmem:[#allocation56_spill] sm:$0xff] %v1284_v21  ;;  %v154_v7 = vadd.f32 1.0, %v150_v31  ;;  %v157_v13 = vadd.f32 2.0, %v149_v40  ;;  %v1342_v1 = vadd.f32 3.0, %v149_v40  ;;  %v158_v4 = vadd.f32 2.0, %v150_v31 }
  0x4e   :  { %2097 = vst [vmem:[#allocation57_spill] sm:$0xff] %v1286_v22  ;;  %2098 = vst [vmem:[#allocation58_spill] sm:$0xff] %v1288_v23  ;;  %906 = vlog2.f32 %v122_v33  ;;  %v156_v9 = vadd.f32 1.0, %v152_v51  ;;  %v1344_v0 = vadd.f32 3.0, %v150_v31  ;;  %v1346_v2 = vadd.f32 1.0, %v903_v3 }
  0x4f   :  { %2099 = vst [vmem:[#allocation59_spill] sm:$0xff] %v1290_v24  ;;  %2100 = vst [vmem:[#allocation60_spill] sm:$0xff] %v1292_v26  ;;  %v159_v26 = vadd.f32 2.0, %v151_v35  ;;  %908 = vlog2.f32 %v123_v6  ;;  %v1348_v21 = vadd.f32 3.0, %v151_v35  ;;  %v1350_v18 = vadd.f32 3.0, %v152_v51 }
  0x50   :  { %2101 = vst [vmem:[#allocation61_spill] sm:$0xff] %v1295_v27  ;;  %2102 = vst [vmem:[#allocation62_spill] sm:$0xff] %v1297_v28  ;;  %v155_v27 = vadd.f32 1.0, %v151_v35  ;;  %v1352_v17 = vadd.f32 4.0, %v149_v40  ;;  %v1354_v24 = vadd.f32 4.0, %v150_v31  ;;  %v1356_v38 = vadd.f32 4.0, %v151_v35 }
  0x51   :  { %2103 = vst [vmem:[#allocation63_spill] sm:$0xff] %v1299_v29  ;;  %2104 = vst [vmem:[#allocation64_spill] sm:$0xff] %v1302_v36  ;;  %v160_v36 = vadd.f32 2.0, %v152_v51  ;;  %v1358_v23 = vadd.f32 4.0, %v152_v51  ;;  %v1360_v33 = vadd.f32 5.0, %v149_v40  ;;  %v1362_v22 = vadd.f32 5.0, %v150_v31 }
  0x52   :  { %2105 = vst [vmem:[#allocation65_spill] sm:$0xff] %v1305_v56  ;;  %2106 = vst [vmem:[#allocation66_spill] sm:$0xff] %v1308_v57  ;;  %v1364_v20 = vadd.f32 5.0, %v151_v35  ;;  %v1366_v3 = vadd.f32 5.0, %v152_v51  ;;  %v1368_v6 = vadd.f32 6.0, %v149_v40  ;;  %v1374_v48 = vadd.f32 6.0, %v152_v51 }
  0x53   :  { %2107 = vst [vmem:[#allocation67_spill] sm:$0xff] %v1310_v61  ;;  %2108 = vst [vmem:[#allocation68_spill] sm:$0xff] %v1314_v39  ;;  %v1370_v39 = vadd.f32 6.0, %v150_v31  ;;  %v1372_v61 = vadd.f32 6.0, %v151_v35  ;;  %v1376_v29 = vadd.f32 7.0, %v149_v40  ;;  %v1378_v28 = vadd.f32 7.0, %v150_v31 }
  0x54   :  { %2109 = vst [vmem:[#allocation69_spill] sm:$0xff] %v1317_v32  ;;  %2110 = vst [vmem:[#allocation70_spill] sm:$0xff] %v1321_v60  ;;  %v185_v11 = vmul.f32 676.5204, %v157_v13  ;;  %v189_v10 = vmul.f32 -1259.1392, %v153_v30  ;;  %v1389_v59 = vmul.f32 %v157_v13, %v153_v30  ;;  %v1391_v58 = vmul.f32 %v158_v4, %v154_v7 }
  0x55   :  { %2111 = vst [vmem:[#allocation71_spill] sm:$0xff] %v1324_v55  ;;  %2112 = vst [vmem:[#allocation72_spill] sm:$0xff] %v1328_v46  ;;  %v1380_v5 = vadd.f32 7.0, %v151_v35  ;;  %v1382_v63 = vadd.f32 7.0, %v152_v51  ;;  %v186_v19 = vmul.f32 676.5204, %v158_v4  ;;  %v1409_v44 = vmul.f32 %v159_v26, %v155_v27 }
  0x56   :  { %2113 = vst [vmem:[#allocation73_spill] sm:$0xff] %v1331_v34  ;;  %2114 = vst [vmem:[#allocation74_spill] sm:$0xff] %v1334_v25  ;;  %v190_v16 = vmul.f32 -1259.1392, %v154_v7  ;;  %v1384_v47 = vadd.f32 8.0, %v149_v40  ;;  %v1386_v15 = vadd.f32 8.0, %v150_v31  ;;  %v193_v50 = vadd.f32 %v189_v10, %v185_v11 }
  0x57   :  { %2115 = vst [vmem:[#allocation75_spill] sm:$0xff] %v1337_v8  ;;  %2116 = vst [vmem:[#allocation76_spill] sm:$0xff] %v1340_v14  ;;  %v187_v12 = vmul.f32 676.5204, %v159_v26  ;;  %v191_v53 = vmul.f32 -1259.1392, %v155_v27  ;;  %v236_v42 = vmul.f32 %v160_v36, %v156_v9 }
  0x58   :  { %2117 = vst [vmem:[#allocation77_spill] sm:$0xff] %v1346_v2  ;;  %v183_v52 = vadd.f32 8.0, %v151_v35  ;;  %v184_v62 = vadd.f32 8.0, %v152_v51  ;;  %v188_v34 = vmul.f32 676.5204, %v160_v36  ;;  %v194_v54 = vadd.f32 %v190_v16, %v186_v19  ;;  %v1399_v11 = vpop.eup %904  ;;  %2120 = vst [vmem:[#allocation80_spill] sm:$0xff] %v1409_v44 }
  0x59   :  { %v192_v45 = vmul.f32 -1259.1392, %v156_v9  ;;  %v197_v49 = vmul.f32 771.3234, %v1352_v17  ;;  %v198_v55 = vmul.f32 771.3234, %v1354_v24  ;;  %v195_v60 = vadd.f32 %v191_v53, %v187_v12 }
  0x5a   :  { %v199_v40 = vmul.f32 771.3234, %v1356_v38  ;;  %v200_v31 = vmul.f32 771.3234, %v1358_v23  ;;  %v201_v35 = vmul.f32 -176.61504, %v1342_v1 }
  0x5b   :  { %v202_v51 = vmul.f32 -176.61504, %v1344_v0  ;;  %v203_v10 = vmul.f32 -176.61504, %v1348_v21  ;;  %2118 = vst [vmem:[#allocation78_spill] sm:$0xff] %v1399_v11  ;;  %v196_v13 = vadd.f32 %v192_v45, %v188_v34  ;;  %v1404_v19 = vpop.eup %906  ;;  %v237_v11 = vmul.f32 %v1352_v17, %v1342_v1 }
  0x5c   :  { %v204_v4 = vmul.f32 -176.61504, %v1350_v18  ;;  %v209_v7 = vmul.f32 12.507343, %v1368_v6  ;;  %v210_v16 = vmul.f32 12.507343, %v1370_v39  ;;  %v1411_v32 = vpop.eup %908  ;;  %v205_v41 = vadd.f32 %v201_v35, %v197_v49 }
  0x5d   :  { %2119 = vst [vmem:[#allocation79_spill] sm:$0xff] %v1404_v19  ;;  %v211_v30 = vmul.f32 12.507343, %v1372_v61  ;;  %v212_v53 = vmul.f32 12.507343, %v1374_v48  ;;  %2121 = vst [vmem:[#allocation81_spill] sm:$0xff] %v1411_v32  ;;  %v206_v8 = vadd.f32 %v202_v51, %v198_v55  ;;  %v207_v32 = vadd.f32 %v203_v10, %v199_v40 }
  0x5e   :  { %v213_v12 = vmul.f32 -0.1385711, %v1360_v33  ;;  %v214_v45 = vmul.f32 -0.1385711, %v1362_v22  ;;  %v215_v34 = vmul.f32 -0.1385711, %v1364_v20  ;;  %v208_v56 = vadd.f32 %v204_v4, %v200_v31 }
  0x5f   :  { %v216_v43 = vmul.f32 -0.1385711, %v1366_v3  ;;  %v221_v19 = vmul.f32 9.984369e-06, %v1384_v47  ;;  %v222_v37 = vmul.f32 9.984369e-06, %v1386_v15  ;;  %v238_v55 = vmul.f32 %v1354_v24, %v1344_v0 }
  0x60   :  { %v225_v14 = vmul.f32 1.5056327e-07, %v1376_v29  ;;  %v223_v57 = vmul.f32 9.984369e-06, %v183_v52  ;;  %v226_v26 = vmul.f32 1.5056327e-07, %v1378_v28  ;;  %v217_v2 = vadd.f32 %v213_v12, %v209_v7 }
  0x61   :  { %v227_v27 = vmul.f32 1.5056327e-07, %v1380_v5  ;;  %v224_v25 = vmul.f32 9.984369e-06, %v184_v62  ;;  %v228_v46 = vmul.f32 1.5056327e-07, %v1382_v63  ;;  %v218_v36 = vadd.f32 %v214_v45, %v210_v16 }
  0x62   :  { %v219_v49 = vadd.f32 %v215_v34, %v211_v30  ;;  %v220_v9 = vadd.f32 %v216_v43, %v212_v53  ;;  %v229_v35 = vadd.f32 %v225_v14, %v221_v19  ;;  %v239_v51 = vmul.f32 %v1356_v38, %v1348_v21  ;;  %v2122_v24 = vld [vmem:[#allocation80_spill] sm:$0xff]  ;;  %v2143_v19 = vld [vmem:[#allocation74_spill] sm:$0xff]  ;;  %v2144_v53 = vld [vmem:[#allocation65_spill] sm:$0xff] }
  0x63   :  { %v230_v44 = vadd.f32 %v226_v26, %v222_v37  ;;  %v231_v40 = vadd.f32 %v227_v27, %v223_v57  ;;  %v240_v31 = vmul.f32 %v1358_v23, %v1350_v18  ;;  %v241_v10 = vmul.f32 %v1368_v6, %v1360_v33  ;;  %v2142_v7 = vld [vmem:[#allocation72_spill] sm:$0xff]  ;;  %v2145_v12 = vld [vmem:[#allocation66_spill] sm:$0xff] }
  0x64   :  { %v232_v4 = vadd.f32 %v228_v46, %v224_v25  ;;  %v242_v43 = vmul.f32 %v1370_v39, %v1362_v22  ;;  %v243_v1 = vmul.f32 %v1372_v61, %v1364_v20  ;;  %v244_v0 = vmul.f32 %v1374_v48, %v1366_v3 }
  0x65   :  { %v245_v37 = vmul.f32 %v1384_v47, %v1376_v29  ;;  %v246_v14 = vmul.f32 %v1386_v15, %v1378_v28  ;;  %v247_v17 = vmul.f32 %v183_v52, %v1380_v5  ;;  %v248_v18 = vmul.f32 %v184_v62, %v1382_v63  ;;  %v2123_v62 = vld [vmem:[#allocation78_spill] sm:$0xff] }
  0x66   :  { %v249_v46 = vmul.f32 %v237_v11, %v193_v50  ;;  %v250_v21 = vmul.f32 %v238_v55, %v194_v54  ;;  %v253_v39 = vmul.f32 %v1389_v59, %v205_v41  ;;  %v254_v22 = vmul.f32 %v1391_v58, %v206_v8  ;;  %v2125_v54 = vld [vmem:[#allocation77_spill] sm:$0xff] }
  0x67   :  { %v251_v20 = vmul.f32 %v239_v51, %v195_v60  ;;  %v252_v23 = vmul.f32 %v240_v31, %v196_v13  ;;  %v255_v48 = vmul.f32 %v2122_v24, %v207_v32  ;;  %v256_v57 = vmul.f32 %v236_v42, %v208_v56 }
  0x68   :  { %v261_v61 = vmul.f32 %v245_v37, %v217_v2  ;;  %v262_v47 = vmul.f32 %v246_v14, %v218_v36  ;;  %v265_v29 = vmul.f32 %v241_v10, %v229_v35  ;;  %v266_v25 = vmul.f32 %v242_v43, %v230_v44 }
  0x69   :  { %v263_v15 = vmul.f32 %v247_v17, %v219_v49  ;;  %v264_v28 = vmul.f32 %v248_v18, %v220_v9  ;;  %v267_v52 = vmul.f32 %v243_v1, %v231_v40  ;;  %v268_v5 = vmul.f32 %v244_v0, %v232_v4 }
  0x6a   :  { %v1448_v50 = vmul.f32 0.6931472, %v2123_v62  ;;  %910 = vlog2.f32 %v2125_v54  ;;  %v1451_v41 = vadd.f32 %v253_v39, %v249_v46  ;;  %v1453_v8 = vadd.f32 %v254_v22, %v250_v21 }
  0x6b   :  { %v1455_v60 = vadd.f32 %v255_v48, %v251_v20  ;;  %v1457_v63 = vadd.f32 %v256_v57, %v252_v23  ;;  %v1460_v2 = vmul.f32 %v237_v11, %v1389_v59  ;;  %v1463_v44 = vmul.f32 %v238_v55, %v1391_v58 }
  0x6c   :  { %2124 = vst [vmem:[#allocation80_spill] sm:$0xff] %v1448_v50  ;;  %2126 = vst [vmem:[#allocation78_spill] sm:$0xff] %v1451_v41  ;;  %v1465_v56 = vadd.f32 %v265_v29, %v261_v61  ;;  %v1467_v32 = vadd.f32 %v266_v25, %v262_v47  ;;  %v1470_v38 = vmul.f32 %v239_v51, %v2122_v24  ;;  %v307_v16 = vadd.f32 1.0, %v2142_v7 }
  0x6d   :  { %2127 = vst [vmem:[#allocation77_spill] sm:$0xff] %v1453_v8  ;;  %2128 = vst [vmem:[#allocation82_spill] sm:$0xff] %v1455_v60  ;;  %v1472_v33 = vmul.f32 %v240_v31, %v236_v42  ;;  %v1474_v3 = vadd.f32 %v267_v52, %v263_v15  ;;  %v1476_v6 = vadd.f32 %v268_v5, %v264_v28  ;;  %v1488_v30 = vadd.f32 1.0, %v2143_v19  ;;  %v2151_v15 = vld [vmem:[#allocation75_spill] sm:$0xff]  ;;  %v2152_v52 = vld [vmem:[#allocation76_spill] sm:$0xff] }
  0x6e   :  { %2129 = vst [vmem:[#allocation83_spill] sm:$0xff] %v1457_v63  ;;  %2130 = vst [vmem:[#allocation84_spill] sm:$0xff] %v1460_v2  ;;  %v1478_v13 = vmul.f32 %v245_v37, %v241_v10  ;;  %v1480_v59 = vmul.f32 %v246_v14, %v242_v43  ;;  %v1482_v11 = vmul.f32 %v247_v17, %v243_v1  ;;  %v309_v42 = vadd.f32 2.0, %v2144_v53 }
  0x6f   :  { %2131 = vst [vmem:[#allocation85_spill] sm:$0xff] %v1463_v44  ;;  %2132 = vst [vmem:[#allocation86_spill] sm:$0xff] %v1465_v56  ;;  %v1484_v58 = vmul.f32 %v248_v18, %v244_v0  ;;  %v310_v45 = vadd.f32 2.0, %v2145_v12  ;;  %v311_v34 = vadd.f32 2.0, %v2142_v7  ;;  %v1494_v26 = vadd.f32 2.0, %v2143_v19 }
  0x70   :  { %2133 = vst [vmem:[#allocation87_spill] sm:$0xff] %v1467_v32  ;;  %2134 = vst [vmem:[#allocation88_spill] sm:$0xff] %v1470_v38  ;;  %v1497_v27 = vadd.f32 3.0, %v2144_v53  ;;  %v1500_v36 = vadd.f32 3.0, %v2145_v12  ;;  %v1503_v49 = vadd.f32 3.0, %v2142_v7  ;;  %v1506_v9 = vadd.f32 3.0, %v2143_v19 }
  0x71   :  { %2135 = vst [vmem:[#allocation89_spill] sm:$0xff] %v1472_v33  ;;  %2136 = vst [vmem:[#allocation90_spill] sm:$0xff] %v1474_v3  ;;  %v1509_v35 = vadd.f32 4.0, %v2144_v53  ;;  %v1512_v55 = vadd.f32 4.0, %v2145_v12  ;;  %v1515_v51 = vadd.f32 4.0, %v2142_v7  ;;  %v1518_v40 = vadd.f32 4.0, %v2143_v19 }
  0x72   :  { %2137 = vst [vmem:[#allocation91_spill] sm:$0xff] %v1476_v6  ;;  %2138 = vst [vmem:[#allocation92_spill] sm:$0xff] %v1478_v13  ;;  %v1521_v31 = vadd.f32 5.0, %v2144_v53  ;;  %v1524_v10 = vadd.f32 5.0, %v2145_v12  ;;  %v1527_v4 = vadd.f32 5.0, %v2142_v7  ;;  %v1530_v43 = vadd.f32 5.0, %v2143_v19 }
  0x73   :  { %2139 = vst [vmem:[#allocation93_spill] sm:$0xff] %v1480_v59  ;;  %2140 = vst [vmem:[#allocation94_spill] sm:$0xff] %v1482_v11  ;;  %v1533_v1 = vadd.f32 6.0, %v2144_v53  ;;  %v1536_v0 = vadd.f32 6.0, %v2145_v12  ;;  %v1539_v37 = vadd.f32 6.0, %v2142_v7  ;;  %v1542_v14 = vadd.f32 6.0, %v2143_v19 }
  0x74   :  { %2141 = vst [vmem:[#allocation95_spill] sm:$0xff] %v1484_v58  ;;  %2146 = vst [vmem:[#allocation72_spill] sm:$0xff] %v1506_v9  ;;  %v329_v17 = vadd.f32 7.0, %v2144_v53  ;;  %v330_v18 = vadd.f32 7.0, %v2145_v12  ;;  %v331_v46 = vadd.f32 7.0, %v2142_v7  ;;  %v1548_v21 = vadd.f32 7.0, %v2143_v19 }
  0x75   :  { %2147 = vst [vmem:[#allocation74_spill] sm:$0xff] %v1518_v40  ;;  %v333_v39 = vadd.f32 8.0, %v2144_v53  ;;  %v334_v22 = vadd.f32 8.0, %v2145_v12  ;;  %v335_v20 = vadd.f32 8.0, %v2142_v7  ;;  %v336_v23 = vadd.f32 8.0, %v2143_v19 }
  0x76   :  { %v1556_v24 = vmul.f32 %v1478_v13, %v1460_v2  ;;  %v337_v48 = vmul.f32 676.5204, %v309_v42  ;;  %v338_v57 = vmul.f32 676.5204, %v310_v45  ;;  %v339_v61 = vmul.f32 676.5204, %v311_v34 }
  0x77   :  { %v1558_v47 = vpop.eup %910  ;;  %v1562_v29 = vmul.f32 %v1480_v59, %v1463_v44  ;;  %v340_v25 = vmul.f32 676.5204, %v1494_v26  ;;  %v341_v28 = vmul.f32 -1259.1392, %v2151_v15  ;;  %v342_v5 = vmul.f32 -1259.1392, %v2152_v52 }
  0x78   :  { %2148 = vst [vmem:[#allocation65_spill] sm:$0xff] %v1556_v24  ;;  %2149 = vst [vmem:[#allocation66_spill] sm:$0xff] %v1558_v47  ;;  %v343_v62 = vmul.f32 -1259.1392, %v307_v16  ;;  %v344_v54 = vmul.f32 -1259.1392, %v1488_v30  ;;  %v1570_v19 = vmul.f32 %v309_v42, %v2151_v15  ;;  %v1576_v47 = vmul.f32 %v310_v45, %v2152_v52 }
  0x79   :  { %2150 = vst [vmem:[#allocation96_spill] sm:$0xff] %v1562_v29  ;;  %v349_v7 = vmul.f32 771.3234, %v1509_v35  ;;  %v350_v53 = vmul.f32 771.3234, %v1512_v55  ;;  %v1581_v60 = vmul.f32 %v311_v34, %v307_v16  ;;  %v345_v44 = vadd.f32 %v341_v28, %v337_v48 }
  0x7a   :  { %2153 = vst [vmem:[#allocation75_spill] sm:$0xff] %v1570_v19  ;;  %v351_v12 = vmul.f32 771.3234, %v1515_v51  ;;  %v352_v50 = vmul.f32 771.3234, %v1518_v40  ;;  %2154 = vst [vmem:[#allocation76_spill] sm:$0xff] %v1576_v47  ;;  %v346_v59 = vadd.f32 %v342_v5, %v338_v57  ;;  %v347_v2 = vadd.f32 %v343_v62, %v339_v61 }
  0x7b   :  { %v353_v6 = vmul.f32 -176.61504, %v1497_v27  ;;  %v354_v63 = vmul.f32 -176.61504, %v1500_v36  ;;  %v355_v3 = vmul.f32 -176.61504, %v1503_v49  ;;  %v348_v48 = vadd.f32 %v344_v54, %v340_v25 }
  0x7c   :  { %2155 = vst [vmem:[#allocation97_spill] sm:$0xff] %v1581_v60  ;;  %v361_v42 = vmul.f32 12.507343, %v1533_v1  ;;  %v362_v15 = vmul.f32 12.507343, %v1536_v0  ;;  %v388_v5 = vmul.f32 %v1494_v26, %v1488_v30  ;;  %v389_v62 = vmul.f32 %v1509_v35, %v1497_v27  ;;  %v2156_v35 = vld [vmem:[#allocation72_spill] sm:$0xff] }
  0x7d   :  { %v363_v32 = vmul.f32 12.507343, %v1539_v37  ;;  %v364_v8 = vmul.f32 12.507343, %v1542_v14  ;;  %v365_v45 = vmul.f32 -0.1385711, %v1521_v31  ;;  %v357_v58 = vadd.f32 %v353_v6, %v349_v7 }
  0x7e   :  { %v366_v52 = vmul.f32 -0.1385711, %v1524_v10  ;;  %v367_v56 = vmul.f32 -0.1385711, %v1527_v4  ;;  %v368_v16 = vmul.f32 -0.1385711, %v1530_v43  ;;  %v393_v19 = vmul.f32 %v1533_v1, %v1521_v31 }
  0x7f   :  { %v373_v34 = vmul.f32 9.984369e-06, %v333_v39  ;;  %v374_v28 = vmul.f32 9.984369e-06, %v334_v22  ;;  %v377_v13 = vmul.f32 1.5056327e-07, %v329_v17  ;;  %v369_v11 = vadd.f32 %v365_v45, %v361_v42 }
  0x80   :  { %v378_v41 = vmul.f32 1.5056327e-07, %v330_v18  ;;  %v356_v29 = vmul.f32 -176.61504, %v1506_v9  ;;  %v375_v24 = vmul.f32 9.984369e-06, %v335_v20  ;;  %v370_v38 = vadd.f32 %v366_v52, %v362_v15 }
  0x81   :  { %v379_v57 = vmul.f32 1.5056327e-07, %v331_v46  ;;  %v376_v33 = vmul.f32 9.984369e-06, %v336_v23  ;;  %v380_v61 = vmul.f32 1.5056327e-07, %v1548_v21  ;;  %v371_v25 = vadd.f32 %v367_v56, %v363_v32 }
  0x82   :  { %v372_v54 = vadd.f32 %v368_v16, %v364_v8  ;;  %v381_v60 = vadd.f32 %v377_v13, %v373_v34  ;;  %v382_v47 = vadd.f32 %v378_v41, %v374_v28  ;;  %v394_v40 = vmul.f32 %v1536_v0, %v1524_v10  ;;  %v2157_v31 = vld [vmem:[#allocation74_spill] sm:$0xff]  ;;  %v2170_v42 = vld [vmem:[#allocation95_spill] sm:$0xff] }
  0x83   :  { %v383_v30 = vadd.f32 %v379_v57, %v375_v24  ;;  %v397_v6 = vmul.f32 %v333_v39, %v329_v17  ;;  %v398_v26 = vmul.f32 %v334_v22, %v330_v18  ;;  %v399_v7 = vmul.f32 %v335_v20, %v331_v46  ;;  %v2158_v17 = vld [vmem:[#allocation75_spill] sm:$0xff]  ;;  %v2160_v20 = vld [vmem:[#allocation97_spill] sm:$0xff] }
  0x84   :  { %v384_v9 = vadd.f32 %v380_v61, %v376_v33  ;;  %v395_v27 = vmul.f32 %v1539_v37, %v1527_v4  ;;  %v396_v56 = vmul.f32 %v1542_v14, %v1530_v43  ;;  %v400_v8 = vmul.f32 %v336_v23, %v1548_v21  ;;  %v2174_v57 = vld [vmem:[#allocation23_spill] sm:$0xff]  ;;  %v2175_v61 = vld [vmem:[#allocation24_spill] sm:$0xff] }
  0x85   :  { %v358_v41 = vadd.f32 %v354_v63, %v350_v53  ;;  %v390_v32 = vmul.f32 %v1512_v55, %v1500_v36  ;;  %v391_v13 = vmul.f32 %v1515_v51, %v1503_v49  ;;  %v392_v10 = vmul.f32 %v2157_v31, %v2156_v35  ;;  %v2159_v49 = vld [vmem:[#allocation76_spill] sm:$0xff]  ;;  %v2184_v35 = vld [vmem:[#allocation70_spill] sm:$0xff] }
  0x86   :  { %v359_v1 = vadd.f32 %v355_v3, %v351_v12  ;;  %v360_v33 = vadd.f32 %v356_v29, %v352_v50  ;;  %v401_v0 = vmul.f32 %v389_v62, %v345_v44  ;;  %v405_v4 = vmul.f32 %v2158_v17, %v357_v58  ;;  %v2167_v29 = vld [vmem:[#allocation94_spill] sm:$0xff]  ;;  %v2169_v12 = vld [vmem:[#allocation89_spill] sm:$0xff] }
  0x87   :  { %v413_v37 = vmul.f32 %v397_v6, %v369_v11  ;;  %v414_v18 = vmul.f32 %v398_v26, %v370_v38  ;;  %v415_v43 = vmul.f32 %v399_v7, %v371_v25  ;;  %v417_v14 = vmul.f32 %v393_v19, %v381_v60  ;;  %v2176_v25 = vld [vmem:[#allocation25_spill] sm:$0xff] }
  0x88   :  { %v416_v46 = vmul.f32 %v400_v8, %v372_v54  ;;  %v418_v63 = vmul.f32 %v394_v40, %v382_v47  ;;  %v419_v21 = vmul.f32 %v395_v27, %v383_v30  ;;  %v420_v39 = vmul.f32 %v396_v56, %v384_v9  ;;  %v2166_v47 = vld [vmem:[#allocation88_spill] sm:$0xff] }
  0x89   :  { %v402_v36 = vmul.f32 %v390_v32, %v346_v59  ;;  %v403_v55 = vmul.f32 %v391_v13, %v347_v2  ;;  %v404_v22 = vmul.f32 %v392_v10, %v348_v48  ;;  %v406_v51 = vmul.f32 %v2159_v49, %v358_v41 }
  0x8a   :  { %v407_v23 = vmul.f32 %v2160_v20, %v359_v1  ;;  %v408_v3 = vmul.f32 %v388_v5, %v360_v33  ;;  %v409_v50 = vadd.f32 %v405_v4, %v401_v0  ;;  %v1616_v44 = vmul.f32 %v389_v62, %v2158_v17  ;;  %v2186_v33 = vld [vmem:[#allocation37_spill] sm:$0xff]  ;;  %v2187_v17 = vld [vmem:[#allocation39_spill] sm:$0xff] }
  0x8b   :  { %v421_v11 = vadd.f32 %v417_v14, %v413_v37  ;;  %v1619_v38 = vmul.f32 %v390_v32, %v2159_v49  ;;  %v1622_v60 = vmul.f32 %v391_v13, %v2160_v20  ;;  %v1624_v58 = vmul.f32 %v392_v10, %v388_v5  ;;  %v2183_v32 = vld [vmem:[#allocation27_spill] sm:$0xff]  ;;  %v2188_v37 = vld [vmem:[#allocation40_spill] sm:$0xff] }
  0x8c   :  { %2161 = vst [vmem:[#allocation72_spill] sm:$0xff] %v1616_v44  ;;  %v422_v2 = vadd.f32 %v418_v63, %v414_v18  ;;  %v423_v59 = vadd.f32 %v419_v21, %v415_v43  ;;  %v424_v9 = vadd.f32 %v420_v39, %v416_v46  ;;  %v1626_v24 = vmul.f32 %v397_v6, %v393_v19  ;;  %v2185_v10 = vld [vmem:[#allocation71_spill] sm:$0xff]  ;;  %v2189_v43 = vld [vmem:[#allocation32_spill] sm:$0xff]  ;;  %v2190_v46 = vld [vmem:[#allocation33_spill] sm:$0xff] }
  0x8d   :  { %2162 = vst [vmem:[#allocation74_spill] sm:$0xff] %v1619_v38  ;;  %2163 = vst [vmem:[#allocation75_spill] sm:$0xff] %v1622_v60  ;;  %v1630_v53 = vmul.f32 %v2167_v29, %v2166_v47  ;;  %v1634_v15 = vmul.f32 %v2170_v42, %v2169_v12  ;;  %v410_v45 = vadd.f32 %v406_v51, %v402_v36  ;;  %v493_v5 = vmul.f32 -1259.1392, %v2174_v57  ;;  %v2191_v21 = vld [vmem:[#allocation28_spill] sm:$0xff]  ;;  %v2192_v36 = vld [vmem:[#allocation73_spill] sm:$0xff] }
  0x8e   :  { %2164 = vst [vmem:[#allocation76_spill] sm:$0xff] %v1624_v58  ;;  %2165 = vst [vmem:[#allocation97_spill] sm:$0xff] %v1626_v24  ;;  %v1636_v52 = vmul.f32 %v398_v26, %v394_v40  ;;  %v1638_v16 = vadd.f32 %v407_v23, %v403_v55  ;;  %v1640_v34 = vadd.f32 %v408_v3, %v404_v22  ;;  %v494_v62 = vmul.f32 -1259.1392, %v2175_v61  ;;  %v2193_v22 = vld [vmem:[#allocation42_spill] sm:$0xff]  ;;  %v2194_v51 = vld [vmem:[#allocation35_spill] sm:$0xff] }
  0x8f   :  { %2168 = vst [vmem:[#allocation98_spill] sm:$0xff] %v1630_v53  ;;  %2171 = vst [vmem:[#allocation99_spill] sm:$0xff] %v1634_v15  ;;  %v1642_v48 = vmul.f32 %v399_v7, %v395_v27  ;;  %v1644_v28 = vmul.f32 %v400_v8, %v396_v56  ;;  %v1647_v19 = vmul.f32 %v1616_v44, %v421_v11  ;;  %v495_v54 = vmul.f32 -1259.1392, %v2176_v25  ;;  %v2181_v27 = vld [vmem:[#allocation26_spill] sm:$0xff]  ;;  %v2182_v8 = vld [vmem:[#allocation69_spill] sm:$0xff] }
  0x90   :  { %2172 = vst [vmem:[#allocation100_spill] sm:$0xff] %v1636_v52  ;;  %v1653_v40 = vmul.f32 %v1626_v24, %v409_v50  ;;  %v1656_v30 = vmul.f32 %v1619_v38, %v422_v2  ;;  %v1659_v6 = vmul.f32 %v1622_v60, %v423_v59  ;;  %v1662_v26 = vmul.f32 %v1624_v58, %v424_v9  ;;  %v2195_v23 = vld [vmem:[#allocation36_spill] sm:$0xff]  ;;  %v2196_v11 = vld [vmem:[#allocation47_spill] sm:$0xff]  ;;  %v2197_v59 = vld [vmem:[#allocation50_spill] sm:$0xff] }
  0x91   :  { %2173 = vst [vmem:[#allocation101_spill] sm:$0xff] %v1647_v19  ;;  %v1665_v7 = vmul.f32 %v1636_v52, %v410_v45  ;;  %v496_v56 = vmul.f32 -1259.1392, %v2181_v27  ;;  %v497_v41 = vadd.f32 %v493_v5, %v2182_v8  ;;  %v1671_v13 = vmul.f32 %v2183_v32, %v2174_v57  ;;  %v2198_v45 = vld [vmem:[#allocation30_spill] sm:$0xff]  ;;  %v2201_v8 = vld [vmem:[#allocation43_spill] sm:$0xff]  ;;  %v2209_v60 = vld [vmem:[#allocation68_spill] sm:$0xff] }
  0x92   :  { %2177 = vst [vmem:[#allocation23_spill] sm:$0xff] %v1656_v30  ;;  %2178 = vst [vmem:[#allocation24_spill] sm:$0xff] %v1659_v6  ;;  %v498_v31 = vadd.f32 %v494_v62, %v2184_v35  ;;  %v499_v1 = vadd.f32 %v495_v54, %v2185_v10  ;;  %v501_v0 = vmul.f32 771.3234, %v2186_v33  ;;  %v502_v4 = vmul.f32 771.3234, %v2187_v17 }
  0x93   :  { %2179 = vst [vmem:[#allocation25_spill] sm:$0xff] %v1662_v26  ;;  %2180 = vst [vmem:[#allocation102_spill] sm:$0xff] %v1665_v7  ;;  %v503_v18 = vmul.f32 771.3234, %v2188_v37  ;;  %v505_v14 = vmul.f32 -176.61504, %v2189_v43  ;;  %v1682_v39 = vmul.f32 %v2191_v21, %v2175_v61  ;;  %v500_v55 = vadd.f32 %v496_v56, %v2192_v36 }
  0x94   :  { %v506_v63 = vmul.f32 -176.61504, %v2190_v46  ;;  %v504_v49 = vmul.f32 771.3234, %v2193_v22  ;;  %v507_v20 = vmul.f32 -176.61504, %v2194_v51  ;;  %v1692_v57 = vmul.f32 %v2198_v45, %v2176_v25 }
  0x95   :  { %v508_v3 = vmul.f32 -176.61504, %v2195_v23  ;;  %v509_v50 = vadd.f32 %v505_v14, %v501_v0  ;;  %v513_v2 = vmul.f32 12.507343, %v2196_v11  ;;  %v514_v9 = vmul.f32 12.507343, %v2197_v59 }
  0x96   :  { %v510_v5 = vadd.f32 %v506_v63, %v502_v4  ;;  %v2199_v61 = vld [vmem:[#allocation51_spill] sm:$0xff]  ;;  %v2200_v54 = vld [vmem:[#allocation54_spill] sm:$0xff]  ;;  %v517_v32 = vmul.f32 -0.1385711, %v2201_v8  ;;  %v511_v35 = vadd.f32 %v507_v20, %v503_v18  ;;  %v2202_v10 = vld [vmem:[#allocation44_spill] sm:$0xff]  ;;  %v541_v19 = vmul.f32 %v2186_v33, %v2189_v43 }
  0x97   :  { %v515_v62 = vmul.f32 12.507343, %v2199_v61  ;;  %v516_v56 = vmul.f32 12.507343, %v2200_v54  ;;  %v518_v21 = vmul.f32 -0.1385711, %v2202_v10  ;;  %v512_v42 = vadd.f32 %v508_v3, %v504_v49 }
  0x98   :  { %v2203_v36 = vld [vmem:[#allocation45_spill] sm:$0xff]  ;;  %v2204_v14 = vld [vmem:[#allocation46_spill] sm:$0xff]  ;;  %v2206_v15 = vld [vmem:[#allocation63_spill] sm:$0xff]  ;;  %v521_v45 = vadd.f32 %v517_v32, %v513_v2  ;;  %v528_v18 = vmul.f32 9.984369e-06, %v2209_v60  ;;  %v544_v32 = vmul.f32 %v2193_v22, %v2195_v23 }
  0x99   :  { %v519_v0 = vmul.f32 -0.1385711, %v2203_v36  ;;  %v520_v12 = vmul.f32 -0.1385711, %v2204_v14  ;;  %v2205_v47 = vld [vmem:[#allocation62_spill] sm:$0xff]  ;;  %v2207_v4 = vld [vmem:[#allocation31_spill] sm:$0xff]  ;;  %v522_v53 = vadd.f32 %v518_v21, %v514_v9 }
  0x9a   :  { %v525_v29 = vmul.f32 9.984369e-06, %v2205_v47  ;;  %v526_v25 = vmul.f32 9.984369e-06, %v2206_v15  ;;  %v540_v63 = vmul.f32 %v2207_v4, %v2181_v27  ;;  %v2208_v58 = vld [vmem:[#allocation67_spill] sm:$0xff]  ;;  %v2211_v38 = vld [vmem:[#allocation57_spill] sm:$0xff]  ;;  %v542_v27 = vmul.f32 %v2187_v17, %v2190_v46 }
  0x9b   :  { %v527_v26 = vmul.f32 9.984369e-06, %v2208_v58  ;;  %v523_v20 = vadd.f32 %v519_v0, %v515_v62  ;;  %v2210_v6 = vld [vmem:[#allocation55_spill] sm:$0xff]  ;;  %v530_v30 = vmul.f32 1.5056327e-07, %v2211_v38  ;;  %v2212_v7 = vld [vmem:[#allocation58_spill] sm:$0xff]  ;;  %v524_v3 = vadd.f32 %v520_v12, %v516_v56 }
  0x9c   :  { %v529_v52 = vmul.f32 1.5056327e-07, %v2210_v6  ;;  %v531_v49 = vmul.f32 1.5056327e-07, %v2212_v7  ;;  %v2213_v24 = vld [vmem:[#allocation59_spill] sm:$0xff]  ;;  %v543_v62 = vmul.f32 %v2188_v37, %v2194_v51  ;;  %v545_v12 = vmul.f32 %v2196_v11, %v2201_v8 }
  0x9d   :  { %v532_v44 = vmul.f32 1.5056327e-07, %v2213_v24  ;;  %v534_v9 = vadd.f32 %v530_v30, %v526_v25  ;;  %v546_v56 = vmul.f32 %v2197_v59, %v2202_v10  ;;  %v549_v33 = vmul.f32 %v2205_v47, %v2210_v6  ;;  %v2214_v25 = vld [vmem:[#allocation101_spill] sm:$0xff] }
  0x9e   :  { %v533_v2 = vadd.f32 %v529_v52, %v525_v29  ;;  %v535_v21 = vadd.f32 %v531_v49, %v527_v26  ;;  %v550_v29 = vmul.f32 %v2206_v15, %v2211_v38  ;;  %v551_v52 = vmul.f32 %v2208_v58, %v2212_v7  ;;  %v2218_v49 = vld [vmem:[#allocation23_spill] sm:$0xff] }
  0x9f   :  { %v536_v0 = vadd.f32 %v532_v44, %v528_v18  ;;  %v552_v30 = vmul.f32 %v2209_v60, %v2213_v24  ;;  %v547_v44 = vmul.f32 %v2199_v61, %v2203_v36  ;;  %v548_v26 = vmul.f32 %v2200_v54, %v2204_v14  ;;  %v2216_v18 = vld [vmem:[#allocation97_spill] sm:$0xff] }
  0xa0   :  { %v553_v17 = vmul.f32 %v541_v19, %v497_v41  ;;  %v554_v37 = vmul.f32 %v542_v27, %v498_v31  ;;  %v555_v43 = vmul.f32 %v543_v62, %v499_v1  ;;  %v557_v47 = vmul.f32 %v1671_v13, %v509_v50 }
  0xa1   :  { %v558_v6 = vmul.f32 %v1682_v39, %v510_v5  ;;  %v559_v38 = vmul.f32 %v1692_v57, %v511_v35  ;;  %v435_v58 = vmul.f32 %v1642_v48, %v1638_v16  ;;  %v436_v60 = vmul.f32 %v1644_v28, %v1640_v34 }
  0xa2   :  { %v565_v24 = vmul.f32 %v549_v33, %v521_v45  ;;  %v566_v15 = vmul.f32 %v550_v29, %v522_v53  ;;  %v556_v7 = vmul.f32 %v544_v32, %v500_v55  ;;  %v560_v46 = vmul.f32 %v540_v63, %v512_v42  ;;  %v2215_v45 = vld [vmem:[#allocation72_spill] sm:$0xff] }
  0xa3   :  { %v567_v22 = vmul.f32 %v551_v52, %v523_v20  ;;  %v568_v41 = vmul.f32 %v552_v30, %v524_v3  ;;  %v569_v31 = vmul.f32 %v545_v12, %v533_v2  ;;  %v570_v1 = vmul.f32 %v546_v56, %v534_v9  ;;  %v2219_v3 = vld [vmem:[#allocation74_spill] sm:$0xff] }
  0xa4   :  { %v571_v51 = vmul.f32 %v547_v44, %v535_v21  ;;  %v572_v23 = vmul.f32 %v548_v26, %v536_v0  ;;  %v561_v50 = vadd.f32 %v557_v47, %v553_v17  ;;  %v562_v11 = vadd.f32 %v558_v6, %v554_v37  ;;  %v2222_v21 = vld [vmem:[#allocation75_spill] sm:$0xff] }
  0xa5   :  { %v563_v59 = vadd.f32 %v559_v38, %v555_v43  ;;  %v577_v5 = vmul.f32 %v541_v19, %v1671_v13  ;;  %v573_v61 = vadd.f32 %v569_v31, %v565_v24  ;;  %v574_v16 = vadd.f32 %v570_v1, %v566_v15  ;;  %v2225_v43 = vld [vmem:[#allocation65_spill] sm:$0xff]  ;;  %v2226_v38 = vld [vmem:[#allocation96_spill] sm:$0xff]  ;;  %v2227_v24 = vld [vmem:[#allocation98_spill] sm:$0xff] }
  0xa6   :  { %v578_v54 = vmul.f32 %v542_v27, %v1682_v39  ;;  %v579_v34 = vmul.f32 %v543_v62, %v1692_v57  ;;  %v575_v53 = vadd.f32 %v571_v51, %v567_v22  ;;  %v581_v55 = vmul.f32 %v549_v33, %v545_v12  ;;  %v2217_v39 = vld [vmem:[#allocation102_spill] sm:$0xff]  ;;  %v2220_v27 = vld [vmem:[#allocation100_spill] sm:$0xff]  ;;  %v2228_v22 = vld [vmem:[#allocation99_spill] sm:$0xff] }
  0xa7   :  { %v582_v42 = vmul.f32 %v550_v29, %v546_v56  ;;  %v583_v8 = vmul.f32 %v551_v52, %v547_v44  ;;  %v564_v35 = vadd.f32 %v560_v46, %v556_v7  ;;  %v576_v10 = vadd.f32 %v572_v23, %v568_v41  ;;  %v2223_v56 = vld [vmem:[#allocation25_spill] sm:$0xff]  ;;  %v2224_v29 = vld [vmem:[#allocation76_spill] sm:$0xff]  ;;  %v2229_v41 = vld [vmem:[#allocation78_spill] sm:$0xff] }
  0xa8   :  { %v580_v36 = vmul.f32 %v544_v32, %v540_v63  ;;  %v584_v14 = vmul.f32 %v552_v30, %v548_v26  ;;  %v441_v4 = vadd.f32 %v2214_v25, %v1653_v40  ;;  %v1748_v19 = vmul.f32 %v2216_v18, %v2215_v45  ;;  %v2221_v63 = vld [vmem:[#allocation24_spill] sm:$0xff]  ;;  %v2231_v51 = vld [vmem:[#allocation86_spill] sm:$0xff]  ;;  %v2241_v25 = vld [vmem:[#allocation83_spill] sm:$0xff] }
  0xa9   :  { %v585_v13 = vmul.f32 %v581_v55, %v561_v50  ;;  %v589_v20 = vmul.f32 %v577_v5, %v573_v61  ;;  %v442_v57 = vadd.f32 %v2218_v49, %v2217_v39  ;;  %v1754_v2 = vmul.f32 %v2220_v27, %v2219_v3  ;;  %v2230_v31 = vld [vmem:[#allocation92_spill] sm:$0xff]  ;;  %v2243_v18 = vld [vmem:[#allocation91_spill] sm:$0xff] }
  0xaa   :  { %v586_v9 = vmul.f32 %v582_v42, %v562_v11  ;;  %v590_v62 = vmul.f32 %v578_v54, %v574_v16  ;;  %v443_v32 = vadd.f32 %v2221_v63, %v435_v58  ;;  %v1759_v40 = vmul.f32 %v1642_v48, %v2222_v21  ;;  %v2232_v23 = vld [vmem:[#allocation84_spill] sm:$0xff]  ;;  %v2235_v16 = vld [vmem:[#allocation87_spill] sm:$0xff]  ;;  %v2248_v21 = vld [vmem:[#allocation53_spill] sm:$0xff] }
  0xab   :  { %v587_v0 = vmul.f32 %v583_v8, %v563_v59  ;;  %v591_v12 = vmul.f32 %v579_v34, %v575_v53  ;;  %v444_v33 = vadd.f32 %v2223_v56, %v436_v60  ;;  %v1764_v52 = vmul.f32 %v1644_v28, %v2224_v29  ;;  %v2233_v59 = vld [vmem:[#allocation77_spill] sm:$0xff]  ;;  %v2245_v49 = vld [vmem:[#allocation79_spill] sm:$0xff]  ;;  %v2246_v27 = vld [vmem:[#allocation52_spill] sm:$0xff] }
  0xac   :  { %v588_v30 = vmul.f32 %v584_v14, %v564_v35  ;;  %v592_v44 = vmul.f32 %v580_v36, %v576_v10  ;;  %v449_v26 = vadd.f32 %v1748_v19, %v441_v4  ;;  %v593_v17 = vadd.f32 %v589_v20, %v585_v13  ;;  %v2239_v35 = vld [vmem:[#allocation90_spill] sm:$0xff]  ;;  %v2240_v10 = vld [vmem:[#allocation88_spill] sm:$0xff]  ;;  %v2242_v4 = vld [vmem:[#allocation95_spill] sm:$0xff] }
  0xad   :  { %v1767_v37 = vmul.f32 %v581_v55, %v577_v5  ;;  %912 = vrcp.f32 %v2225_v43  ;;  %v450_v48 = vadd.f32 %v1754_v2, %v442_v57  ;;  %v594_v47 = vadd.f32 %v590_v62, %v586_v9  ;;  %v2234_v5 = vld [vmem:[#allocation93_spill] sm:$0xff]  ;;  %v2237_v55 = vld [vmem:[#allocation82_spill] sm:$0xff]  ;;  %v2250_v29 = vld [vmem:[#allocation56_spill] sm:$0xff] }
  0xae   :  { %v1771_v6 = vmul.f32 %v582_v42, %v578_v54  ;;  %914 = vrcp.f32 %v2226_v38  ;;  %v451_v58 = vadd.f32 %v1759_v40, %v443_v32  ;;  %v595_v28 = vadd.f32 %v591_v12, %v587_v0  ;;  %v2236_v54 = vld [vmem:[#allocation85_spill] sm:$0xff]  ;;  %v2238_v42 = vld [vmem:[#allocation94_spill] sm:$0xff] }
  0xaf   :  { %v1775_v60 = vmul.f32 %v583_v8, %v579_v34  ;;  %916 = vrcp.f32 %v2227_v24  ;;  %v452_v15 = vadd.f32 %v1764_v52, %v444_v33  ;;  %v596_v7 = vadd.f32 %v592_v44, %v588_v30  ;;  %v2244_v13 = vld [vmem:[#allocation89_spill] sm:$0xff]  ;;  %v2249_v12 = vld [vmem:[#allocation66_spill] sm:$0xff] }
  0xb0   :  { %v1779_v46 = vmul.f32 %v584_v14, %v580_v36  ;;  %918 = vrcp.f32 %v2228_v22  ;;  %v281_v1 = vmul.f32 %v2230_v31, %v2229_v41  ;;  %v285_v50 = vmul.f32 %v2232_v23, %v2231_v51  ;;  %v2247_v62 = vld [vmem:[#allocation81_spill] sm:$0xff]  ;;  %v2257_v41 = vld [vmem:[#allocation16_spill] sm:$0xff] }
  0xb1   :  { %v601_v11 = vadd.f32 %v1767_v37, %v593_v17  ;;  %920 = vrcp.f32 %v449_v26  ;;  %v282_v61 = vmul.f32 %v2234_v5, %v2233_v59  ;;  %v286_v34 = vmul.f32 %v2236_v54, %v2235_v16  ;;  %v2251_v44 = vld [vmem:[#allocation17_spill] sm:$0xff]  ;;  %v2252_v26 = vld [vmem:[#allocation15_spill] sm:$0xff]  ;;  %v2259_v23 = vld [vmem:[#allocation48_spill] sm:$0xff] }
  0xb2   :  { %v602_v53 = vadd.f32 %v1771_v6, %v594_v47  ;;  %922 = vrcp.f32 %v450_v48  ;;  %v283_v8 = vmul.f32 %v2238_v42, %v2237_v55  ;;  %v287_v36 = vmul.f32 %v2240_v10, %v2239_v35  ;;  %v2254_v48 = vld [vmem:[#allocation80_spill] sm:$0xff]  ;;  %v2260_v59 = vld [vmem:[#allocation21_spill] sm:$0xff]  ;;  %v2261_v5 = vld [vmem:[#allocation18_spill] sm:$0xff] }
  0xb3   :  { %v603_v14 = vadd.f32 %v1775_v60, %v595_v28  ;;  %924 = vrcp.f32 %v451_v58  ;;  %v284_v45 = vmul.f32 %v2242_v4, %v2241_v25  ;;  %v288_v20 = vmul.f32 %v2244_v13, %v2243_v18  ;;  %v2255_v28 = vld [vmem:[#allocation60_spill] sm:$0xff]  ;;  %v2264_v42 = vld [vmem:[#allocation22_spill] sm:$0xff] }
  0xb4   :  { %v604_v39 = vadd.f32 %v1779_v46, %v596_v7  ;;  %926 = vrcp.f32 %v452_v15  ;;  %v128_v57 = vmul.f32 0.6931472, %v2245_v49  ;;  %v289_v3 = vadd.f32 %v285_v50, %v281_v1  ;;  %v2256_v7 = vld [vmem:[#allocation19_spill] sm:$0xff]  ;;  %v1844_v49 = vld [vmem:[#allocation2] sm:$0xff] }
  0xb5   :  { %928 = vrcp.f32 %v601_v11  ;;  %v641_v9 = vadd.f32 7.5, %v2246_v27  ;;  %v130_v63 = vmul.f32 0.6931472, %v2247_v62  ;;  %v290_v32 = vadd.f32 %v286_v34, %v282_v61  ;;  %v2263_v34 = vld [vmem:[#allocation49_spill] sm:$0xff] }
  0xb6   :  { %930 = vrcp.f32 %v602_v53  ;;  %v642_v0 = vadd.f32 7.5, %v2248_v21  ;;  %v132_v56 = vmul.f32 0.6931472, %v2249_v12  ;;  %v291_v33 = vadd.f32 %v287_v36, %v283_v8  ;;  %v2265_v8 = vld [vmem:[#allocation20_spill] sm:$0xff]  ;;  %v2267_v36 = vld [vmem:[#allocation61_spill] sm:$0xff] }
  0xb7   :  { %932 = vrcp.f32 %v603_v14  ;;  %v643_v30 = vadd.f32 7.5, %v2250_v29  ;;  %v2253_v17 = vmax.f32 %v2251_v44, %v2252_v26  ;;  %v292_v58 = vadd.f32 %v288_v20, %v284_v45 }
  0xb8   :  { %934 = vrcp.f32 %v604_v39  ;;  %v644_v15 = vadd.f32 7.5, %v2255_v28  ;;  %v2258_v31 = vmax.f32 %v2256_v7, %v2257_v41  ;;  %v297_v51 = vadd.f32 %v2225_v43, %v289_v3 }
  0xb9   :  { %v1812_v47 = vadd.f32 %v2254_v48, %v2253_v17  ;;  %936 = vlog2.f32 %v641_v9  ;;  %v665_v50 = vadd.f32 7.5, %v2259_v23  ;;  %v2262_v61 = vmax.f32 %v2260_v59, %v2261_v5 }
  0xba   :  { %v1818_v1 = vadd.f32 %v128_v57, %v2258_v31  ;;  %v913_v11 = vpop.eup %912  ;;  %v298_v54 = vadd.f32 %v2226_v38, %v290_v32  ;;  %938 = vlog2.f32 %v642_v0  ;;  %v666_v53 = vadd.f32 7.5, %v2263_v34  ;;  %v2268_v38 = vld [vmem:[#allocation64_spill] sm:$0xff] }
  0xbb   :  { %v1825_v16 = vadd.f32 %v130_v63, %v2262_v61  ;;  %v915_v55 = vpop.eup %914  ;;  %v2266_v35 = vmax.f32 %v2264_v42, %v2265_v8  ;;  %v299_v43 = vadd.f32 %v2227_v24, %v291_v33  ;;  %940 = vlog2.f32 %v643_v30 }
  0xbc   :  { %v667_v14 = vadd.f32 7.5, %v2267_v36  ;;  %v917_v25 = vpop.eup %916  ;;  %v300_v4 = vadd.f32 %v2228_v22, %v292_v58  ;;  %v1838_v45 = vadd.f32 0.5, %v2246_v27  ;;  %942 = vlog2.f32 %v644_v15  ;;  %v1850_v27 = vld [vmem:[#allocation2 + $0x8] sm:$0xff] }
  0xbd   :  { %v1832_v10 = vadd.f32 %v132_v56, %v2266_v35  ;;  %v668_v18 = vadd.f32 7.5, %v2268_v38  ;;  %v919_v13 = vpop.eup %918  ;;  %v606_v20 = vmul.f32 %v913_v11, %v297_v51  ;;  %v1842_v39 = vadd.f32 0.5, %v2248_v21  ;;  %v1854_v21 = vld [vmem:[#allocation2 + $0x10] sm:$0xff] }
  0xbe   :  { %944 = vlog2.f32 %v665_v50  ;;  %v689_v24 = vadd.f32 7.5, %v1844_v49  ;;  %v921_v57 = vpop.eup %920  ;;  %v608_v3 = vmul.f32 %v915_v55, %v298_v54  ;;  %v1848_v22 = vadd.f32 0.5, %v2250_v29  ;;  %v1858_v29 = vld [vmem:[#allocation2 + $0x18] sm:$0xff] }
  0xbf   :  { %946 = vlog2.f32 %v666_v53  ;;  %v690_v9 = vadd.f32 7.5, %v1850_v27  ;;  %v923_v62 = vpop.eup %922  ;;  %v610_v63 = vmul.f32 %v917_v25, %v299_v43  ;;  %v614_v32 = vmul.f32 %v921_v57, %v1748_v19 }
  0xc0   :  { %948 = vlog2.f32 %v667_v14  ;;  %v691_v0 = vadd.f32 7.5, %v1854_v21  ;;  %v925_v12 = vpop.eup %924  ;;  %v612_v56 = vmul.f32 %v919_v13, %v300_v4  ;;  %v616_v33 = vmul.f32 %v923_v62, %v1754_v2  ;;  %v1004_v14 = vld [vmem:[#allocation7] sm:$0xff] }
  0xc1   :  { %950 = vlog2.f32 %v668_v18  ;;  %v692_v30 = vadd.f32 7.5, %v1858_v29  ;;  %v927_v44 = vpop.eup %926  ;;  %v618_v26 = vmul.f32 %v925_v12, %v1759_v40  ;;  %v621_v17 = vmul.f32 %v614_v32, %v606_v20  ;;  %v1005_v18 = vld [vmem:[#allocation7 + $0x8] sm:$0xff]  ;;  %v1007_v12 = vld [vmem:[#allocation7 + $0x18] sm:$0xff] }
  0xc2   :  { %v640_v19 = vadd.f32 0.5, %v2255_v28  ;;  %952 = vlog2.f32 %v689_v24  ;;  %v929_v48 = vpop.eup %928  ;;  %v620_v58 = vmul.f32 %v927_v44, %v1764_v52  ;;  %v622_v15 = vmul.f32 %v616_v33, %v608_v3  ;;  %v1006_v3 = vld [vmem:[#allocation7 + $0x10] sm:$0xff] }
  0xc3   :  { %v661_v7 = vadd.f32 0.5, %v2259_v23  ;;  %954 = vlog2.f32 %v690_v9  ;;  %v931_v2 = vpop.eup %930  ;;  %v623_v41 = vmul.f32 %v618_v26, %v610_v63  ;;  %v626_v31 = vmul.f32 %v929_v48, %v1767_v37  ;;  %v1008_v26 = vld [vmem:[#allocation5] sm:$0xff] }
  0xc4   :  { %v662_v51 = vadd.f32 0.5, %v2263_v34  ;;  %956 = vlog2.f32 %v691_v0  ;;  %v933_v50 = vpop.eup %932  ;;  %v624_v40 = vmul.f32 %v620_v58, %v612_v56  ;;  %v628_v11 = vmul.f32 %v931_v2, %v1771_v6  ;;  %v1009_v2 = vld [vmem:[#allocation5 + $0x8] sm:$0xff] }
  0xc5   :  { %v663_v28 = vadd.f32 0.5, %v2267_v36  ;;  %958 = vlog2.f32 %v692_v30  ;;  %v935_v59 = vpop.eup %934  ;;  %v630_v52 = vmul.f32 %v933_v50, %v1775_v60  ;;  %v633_v5 = vmul.f32 %v626_v31, %v621_v17 }
  0xc6   :  { %v664_v23 = vadd.f32 0.5, %v2268_v38  ;;  %v1872_v61 = vadd.f32 0.5, %v1844_v49  ;;  %v937_v37 = vpop.eup %936  ;;  %v632_v54 = vmul.f32 %v935_v59, %v1779_v46  ;;  %v634_v34 = vmul.f32 %v628_v11, %v622_v15  ;;  %v2269_v11 = vld [vmem:[#allocation29_spill] sm:$0xff] }
  0xc7   :  { %v1876_v53 = vadd.f32 0.5, %v1850_v27  ;;  %v1879_v6 = vadd.f32 0.5, %v1854_v21  ;;  %v939_v55 = vpop.eup %938  ;;  %v635_v42 = vmul.f32 %v630_v52, %v623_v41  ;;  %v646_v8 = vmul.f32 0.6931472, %v937_v37 }
  0xc8   :  { %v1882_v60 = vadd.f32 0.5, %v1858_v29  ;;  %960 = vlog2.f32 %v633_v5  ;;  %v941_v35 = vpop.eup %940  ;;  %v636_v43 = vmul.f32 %v632_v54, %v624_v40  ;;  %v648_v36 = vmul.f32 0.6931472, %v939_v55 }
  0xc9   :  { %962 = vlog2.f32 %v634_v34  ;;  %v721_v46 = vsub.f32 %v1004_v14, %v1812_v47  ;;  %v943_v25 = vpop.eup %942  ;;  %v650_v4 = vmul.f32 0.6931472, %v941_v35  ;;  %v653_v38 = vmul.f32 %v646_v8, %v1838_v45 }
  0xca   :  { %964 = vlog2.f32 %v635_v42  ;;  %v722_v13 = vsub.f32 %v1005_v18, %v1818_v1  ;;  %v652_v24 = vmul.f32 0.6931472, %v943_v25  ;;  %v654_v57 = vmul.f32 %v648_v36, %v1842_v39  ;;  %v1897_v42 = vld [vmem:[#allocation8 + $0x8] sm:$0xff]  ;;  %v1904_v25 = vld [vmem:[#allocation8 + $0x18] sm:$0xff] }
  0xcb   :  { %v945_v20 = vpop.eup %944  ;;  %966 = vlog2.f32 %v636_v43  ;;  %v723_v9 = vsub.f32 %v1006_v3, %v1825_v16  ;;  %v655_v63 = vmul.f32 %v650_v4, %v1848_v22  ;;  %v657_v32 = vadd.f32 6.5810614, %v653_v38 }
  0xcc   :  { %v947_v62 = vpop.eup %946  ;;  %v670_v0 = vmul.f32 0.6931472, %v945_v20  ;;  %v724_v45 = vsub.f32 %v1007_v12, %v1832_v10  ;;  %v656_v33 = vmul.f32 %v652_v24, %v640_v19  ;;  %v658_v30 = vadd.f32 6.5810614, %v654_v57  ;;  %v1894_v19 = vld [vmem:[#allocation8] sm:$0xff] }
  0xcd   :  { %v949_v56 = vpop.eup %948  ;;  %v672_v44 = vmul.f32 0.6931472, %v947_v62  ;;  %v733_v17 = vsub.f32 %v1008_v26, %v1812_v47  ;;  %v659_v48 = vadd.f32 6.5810614, %v655_v63  ;;  %v734_v41 = vsub.f32 %v1009_v2, %v1818_v1  ;;  %v2270_v47 = vld [vmem:[#allocation34_spill] sm:$0xff] }
  0xce   :  { %v951_v39 = vpop.eup %950  ;;  %v674_v58 = vmul.f32 0.6931472, %v949_v56  ;;  %v677_v15 = vmul.f32 %v670_v0, %v661_v7  ;;  %v660_v31 = vadd.f32 6.5810614, %v656_v33  ;;  %v725_v59 = vmul.f32 %v2269_v11, %v721_v46  ;;  %v2271_v24 = vld [vmem:[#allocation38_spill] sm:$0xff] }
  0xcf   :  { %v953_v22 = vpop.eup %952  ;;  %v676_v50 = vmul.f32 0.6931472, %v951_v39  ;;  %v678_v40 = vmul.f32 %v672_v44, %v662_v51  ;;  %v726_v34 = vmul.f32 %v2270_v47, %v722_v13  ;;  %v797_v35 = vand.u32 2147483647, %v1894_v19  ;;  %v1900_v51 = vld [vmem:[#allocation8 + $0x10] sm:$0xff] }
  0xd0   :  { %v955_v52 = vpop.eup %954  ;;  %v679_v5 = vmul.f32 %v674_v58, %v663_v28  ;;  %v681_v37 = vsub.f32 %v657_v32, %v677_v15  ;;  %v694_v54 = vmul.f32 0.6931472, %v953_v22  ;;  %v798_v28 = vand.u32 2147483647, %v1897_v42  ;;  %v2272_v32 = vld [vmem:[#allocation41_spill] sm:$0xff] }
  0xd1   :  { %v957_v55 = vpop.eup %956  ;;  %v680_v7 = vmul.f32 %v676_v50, %v664_v23  ;;  %v682_v8 = vsub.f32 %v658_v30, %v678_v40  ;;  %v696_v1 = vmul.f32 0.6931472, %v955_v52  ;;  %v799_v23 = vand.u32 2147483647, %v1900_v51 }
  0xd2   :  { %v959_v43 = vpop.eup %958  ;;  %v683_v36 = vsub.f32 %v659_v48, %v679_v5  ;;  %v698_v14 = vmul.f32 0.6931472, %v957_v55  ;;  %v701_v46 = vmul.f32 %v694_v54, %v1872_v61  ;;  %v727_v57 = vmul.f32 %v2271_v24, %v723_v9  ;;  %v1011_v9 = vld [vmem:[#allocation5 + $0x18] sm:$0xff] }
  0xd3   :  { %v684_v4 = vsub.f32 %v660_v31, %v680_v7  ;;  %v700_v38 = vmul.f32 0.6931472, %v959_v43  ;;  %v702_v18 = vmul.f32 %v696_v1, %v1876_v53  ;;  %v800_v3 = vand.u32 2147483647, %v1904_v25  ;;  %v1010_v53 = vld [vmem:[#allocation5 + $0x10] sm:$0xff] }
  0xd4   :  { %v703_v13 = vmul.f32 %v698_v14, %v1879_v6  ;;  %v705_v20 = vsub.f32 %v681_v37, %v701_v46  ;;  %v728_v0 = vmul.f32 %v2272_v32, %v724_v45  ;;  %v801_v12 = vsub.f32 0.0, %v797_v35 }
  0xd5   :  { %v961_v62 = vpop.eup %960  ;;  %v704_v61 = vmul.f32 %v700_v38, %v1882_v60  ;;  %v706_v63 = vsub.f32 %v682_v8, %v702_v18  ;;  %v735_v44 = vsub.f32 %v1010_v53, %v1825_v16  ;;  %v802_v26 = vsub.f32 0.0, %v798_v28 }
  0xd6   :  { %v963_v56 = vpop.eup %962  ;;  %v707_v33 = vsub.f32 %v683_v36, %v703_v13  ;;  %v710_v30 = vmul.f32 0.6931472, %v961_v62  ;;  %v736_v58 = vsub.f32 %v1011_v9, %v1832_v10  ;;  %v803_v15 = vsub.f32 0.0, %v799_v23 }
  0xd7   :  { %v965_v6 = vpop.eup %964  ;;  %v708_v39 = vsub.f32 %v684_v4, %v704_v61  ;;  %v712_v48 = vmul.f32 0.6931472, %v963_v56  ;;  %v737_v45 = vmul.f32 %v1844_v49, %v733_v17  ;;  %v804_v31 = vsub.f32 0.0, %v800_v3 }
  0xd8   :  { %v967_v2 = vpop.eup %966  ;;  %v714_v60 = vmul.f32 0.6931472, %v965_v6  ;;  %v717_v22 = vadd.f32 %v710_v30, %v705_v20  ;;  %v738_v11 = vmul.f32 %v1850_v27, %v734_v41  ;;  %v805_v52 = vmul.f32 1.442695, %v801_v12 }
  0xd9   :  { %v716_v50 = vmul.f32 0.6931472, %v967_v2  ;;  %v718_v40 = vadd.f32 %v712_v48, %v706_v63  ;;  %v739_v37 = vmul.f32 %v1854_v21, %v735_v44  ;;  %v807_v54 = vmul.f32 1.442695, %v802_v26 }
  0xda   :  { %v719_v16 = vadd.f32 %v714_v60, %v707_v33  ;;  %v729_v5 = vadd.f32 %v725_v59, %v717_v22  ;;  %v740_v10 = vmul.f32 %v1858_v29, %v736_v58  ;;  %v809_v7 = vmul.f32 1.442695, %v803_v15 }
  0xdb   :  { %v720_v47 = vadd.f32 %v716_v50, %v708_v39  ;;  %v730_v55 = vadd.f32 %v726_v34, %v718_v40  ;;  %v811_v17 = vmul.f32 1.442695, %v804_v31  ;;  %968 = vpow2.f32 %v805_v52 }
  0xdc   :  { %v731_v8 = vadd.f32 %v727_v57, %v719_v16  ;;  %v1919_v1 = vadd.f32 %v737_v45, %v729_v5  ;;  %970 = vpow2.f32 %v807_v54  ;;  %v793_v31 = vmax.f32 %v1894_v19, 0.0 }
  0xdd   :  { %v732_v35 = vadd.f32 %v728_v0, %v720_v47  ;;  %v1921_v43 = vadd.f32 %v738_v11, %v730_v55  ;;  %972 = vpow2.f32 %v809_v7  ;;  %v794_v11 = vmax.f32 %v1897_v42, 0.0 }
  0xde   :  { %v1923_v41 = vadd.f32 %v739_v37, %v731_v8  ;;  %v753_v59 = vsub.f32 %v1894_v19, %v1919_v1  ;;  %974 = vpow2.f32 %v811_v17  ;;  %v749_v40 = vmax.f32 %v1894_v19, %v1919_v1 }
  0xdf   :  { %v1927_v36 = vadd.f32 %v740_v10, %v732_v35  ;;  %v754_v34 = vsub.f32 %v1897_v42, %v1921_v43  ;;  %v750_v5 = vmax.f32 %v1897_v42, %v1921_v43  ;;  %v795_v37 = vmax.f32 %v1900_v51, 0.0 }
  0xe0   :  { %v755_v14 = vsub.f32 %v1900_v51, %v1923_v41  ;;  %v757_v46 = vand.u32 2147483647, %v753_v59  ;;  %v751_v55 = vmax.f32 %v1900_v51, %v1923_v41  ;;  %v796_v7 = vmax.f32 %v1904_v25, 0.0 }
  0xe1   :  { %v756_v28 = vsub.f32 %v1904_v25, %v1927_v36  ;;  %v758_v4 = vand.u32 2147483647, %v754_v34  ;;  %vm745_vm0 = vcmp.lt.f32.partialorder %v1844_v49, 0.5  ;;  %v752_v19 = vmax.f32 %v1904_v25, %v1927_v36 }
  0xe2   :  { %v759_v38 = vand.u32 2147483647, %v755_v14  ;;  %v761_v18 = vsub.f32 0.0, %v757_v46  ;;  %vm746_vm1 = vcmp.lt.f32.partialorder %v1850_v27, 0.5  ;;  %vm747_vm2 = vcmp.lt.f32.partialorder %v1854_v21, 0.5 }
  0xe3   :  { %v760_v23 = vand.u32 2147483647, %v756_v28  ;;  %v762_v13 = vsub.f32 0.0, %v758_v4  ;;  %vm748_vm3 = vcmp.lt.f32.partialorder %v1858_v29, 0.5 }
  0xe4   :  { %v763_v20 = vsub.f32 0.0, %v759_v38  ;;  %v765_v24 = vmul.f32 1.442695, %v761_v18 }
  0xe5   :  { %v764_v57 = vsub.f32 0.0, %v760_v23  ;;  %v767_v3 = vmul.f32 1.442695, %v762_v13 }
  0xe6   :  { %976 = vpow2.f32 %v765_v24  ;;  %v769_v62 = vmul.f32 1.442695, %v763_v20 }
  0xe7   :  { %978 = vpow2.f32 %v767_v3  ;;  %v771_v61 = vmul.f32 1.442695, %v764_v57 }
  0xe8   :  { %980 = vpow2.f32 %v769_v62  ;;  %v969_v63 = vpop.eup %968 }
  0xe9   :  { %982 = vpow2.f32 %v771_v61  ;;  %v971_v32 = vpop.eup %970  ;;  %v813_v56 = vadd.f32 1.0, %v969_v63 }
  0xea   :  { %v973_v0 = vpop.eup %972  ;;  %v814_v33 = vadd.f32 1.0, %v971_v32 }
  0xeb   :  { %v975_v12 = vpop.eup %974  ;;  %v815_v30 = vadd.f32 1.0, %v973_v0  ;;  %984 = vlog2.f32 %v813_v56 }
  0xec   :  { %v816_v53 = vadd.f32 1.0, %v975_v12  ;;  %986 = vlog2.f32 %v814_v33 }
  0xed   :  { %988 = vlog2.f32 %v815_v30 }
  0xee   :  { %990 = vlog2.f32 %v816_v53 }
  0xf3   :  { %v977_v44 = vpop.eup %976 }
  0xf4   :  { %v979_v26 = vpop.eup %978  ;;  %v773_v6 = vadd.f32 1.0, %v977_v44 }
  0xf5   :  { %v981_v39 = vpop.eup %980  ;;  %v774_v48 = vadd.f32 1.0, %v979_v26 }
  0xf6   :  { %v983_v9 = vpop.eup %982  ;;  %v775_v58 = vadd.f32 1.0, %v981_v39  ;;  %992 = vlog2.f32 %v773_v6 }
  0xf7   :  { %v776_v15 = vadd.f32 1.0, %v983_v9  ;;  %994 = vlog2.f32 %v774_v48 }
  0xf8   :  { %996 = vlog2.f32 %v775_v58  ;;  %v985_v2 = vpop.eup %984 }
  0xf9   :  { %998 = vlog2.f32 %v776_v15  ;;  %v987_v60 = vpop.eup %986  ;;  %v818_v50 = vmul.f32 0.6931472, %v985_v2 }
  0xfa   :  { %v989_v22 = vpop.eup %988  ;;  %v820_v52 = vmul.f32 0.6931472, %v987_v60 }
  0xfb   :  { %v991_v45 = vpop.eup %990  ;;  %v822_v54 = vmul.f32 0.6931472, %v989_v22  ;;  %v825_v59 = vadd.f32 %v818_v50, %v793_v31 }
  0xfc   :  { %v824_v8 = vmul.f32 0.6931472, %v991_v45  ;;  %v826_v46 = vadd.f32 %v820_v52, %v794_v11 }
  0xfd   :  { %v827_v4 = vadd.f32 %v822_v54, %v795_v37 }
  0xfe   :  { %v828_v18 = vadd.f32 %v824_v8, %v796_v7 }
 0x103   :  { %v993_v16 = vpop.eup %992 }
 0x104   :  { %v995_v47 = vpop.eup %994  ;;  %v778_v10 = vmul.f32 0.6931472, %v993_v16 }
 0x105   :  { %v997_v17 = vpop.eup %996  ;;  %v780_v35 = vmul.f32 0.6931472, %v995_v47 }
 0x106   :  { %v999_v42 = vpop.eup %998  ;;  %v782_v34 = vmul.f32 0.6931472, %v997_v17  ;;  %v785_v14 = vadd.f32 %v778_v10, %v749_v40 }
 0x107   :  { %v784_v51 = vmul.f32 0.6931472, %v999_v42  ;;  %v786_v28 = vadd.f32 %v780_v35, %v750_v5 }
 0x108   :  { %v787_v38 = vadd.f32 %v782_v34, %v751_v55  ;;  %v789_v49 = vsel %vm745_vm0, %v785_v14, %v1919_v1 }
 0x109   :  { %v788_v25 = vadd.f32 %v784_v51, %v752_v19  ;;  %v790_v23 = vsel %vm746_vm1, %v786_v28, %v1921_v43  ;;  %v829_v13 = vsub.f32 %v789_v49, %v825_v59 }
 0x10a   :  { %v791_v27 = vsel %vm747_vm2, %v787_v38, %v1923_v41  ;;  %v830_v20 = vsub.f32 %v790_v23, %v826_v46 }
 0x10b   :  { %v792_v24 = vsel %vm748_vm3, %v788_v25, %v1927_v36  ;;  %v831_v57 = vsub.f32 %v791_v27, %v827_v4  ;;  %v833_v21 = vsub.f32 0.0, %v829_v13 }
 0x10c   :  { %v832_v3 = vsub.f32 %v792_v24, %v828_v18  ;;  %v834_v62 = vsub.f32 0.0, %v830_v20 }
 0x10d   :  { %v835_v61 = vsub.f32 0.0, %v831_v57 }
 0x10e   :  { %v836_v63 = vsub.f32 0.0, %v832_v3 }
 0x10f   :  { %v837_v29 = vadd.f32 %v835_v61, %v833_v21 }
 0x110   :  { %v844_v32 = vadd.f32 %v836_v63, %v834_v62 }
 0x111   :  { %v838_v0 = vrot.slane %v837_v29, 4 }
 0x112   :  { %v845_v1 = vrot.slane %v844_v32, 4 }
 0x113   :  { %v839_v12 = vadd.f32 %v838_v0, %v837_v29 }
 0x114   :  { %v846_v56 = vadd.f32 %v845_v1, %v844_v32 }
 0x115   :  { %v840_v33 = vrot.slane %v839_v12, 2 }
 0x116   :  { %v847_v43 = vrot.slane %v846_v56, 2 }
 0x117   :  { %v841_v30 = vadd.f32 %v840_v33, %v839_v12 }
 0x118   :  { %v848_v53 = vadd.f32 %v847_v43, %v846_v56 }
 0x119   :  { %v842_v41 = vrot.slane %v841_v30, 1 }
 0x11a   :  { %v849_v44 = vrot.slane %v848_v53, 1 }
 0x11b   :  { %v843_v26 = vadd.f32 %v842_v41, %v841_v30 }
 0x11c   :  { %v850_v36 = vadd.f32 %v849_v44, %v848_v53 }
 0x11e   :  { %v851_v6 = vadd.f32 %v850_v36, %v843_v26 }
 0x120   :  { %852 = vadd.xlane.f32.xlu0 %v851_v6 }
 0x1a9   :  { %v853_v39 = vpop.xlane.xlu0 %852 }
 0x1aa   :  { %855 = vst [vmem:[#allocation10] sm:$0xff] %v853_v39 }
 0x1ab   :  { %1103 = shalt.err (!%p1100_p10)
}
 0x1ac   :  { %865 = dma.vmem_to_hbm [thread:$0]  %s863_s3, 128, %s1962_s4, [#allocation4]  }
 0x1ad   :  { %1118 = dma.done.wait [#allocation4], 128  }
 0x1ae   :  { %1119 = vsyncadd [#allocation4], 4294967168 }
 0x1af   :  { %869 = vsyncpa [#allocation3], 1 }
 0x1b0   :  { %870 = vsyncpa [#allocation6], 1 }
 0x1b1   :  { %871 = vsyncpa [#allocation9], 1 }
 0x1b2   :  { %872 = vsyncpa [#allocation4], 1 }

</bundles_post_ra>
